<compile_context>
chip_gen: v7x
topology: tpu7x:2x2x1
jax: 0.10.0
libtpu: 0.0.40
codegen_flags: <defaults>
</compile_context>

<pallas_src>
import functools

import jax
import jax.numpy as jnp
from jax.experimental import pallas as pl
from jax.experimental.pallas import tpu as pltpu


# ---------------------------------------------------------------------------
# Kernel
# ---------------------------------------------------------------------------
def _coupling_kernel(*refs, reverse, num_layers, op_dtype):
    """y = x (+/-) MLP_expanded(x) on one lane-dense (tile_b, D) tile.

    refs = (x_ref, w0, b0, ..., w{L-1}, b{L-1}, y_ref).  First/last weights
    are pre-expanded with zero rows/cols at the untouched parity, so every
    load/store is lane-dense and pass-through rows get exactly +0.
    """
    x_ref = refs[0]
    y_ref = refs[-1]
    w_refs = refs[1:-1:2]
    b_refs = refs[2:-1:2]

    h = x_ref[...].astype(op_dtype)              # matmul-operand dtype
    for li in range(num_layers):                 # unrolled at trace time
        # Weights already live in op_dtype (pre-cast once in the wrapper).
        h = jnp.dot(h, w_refs[li][...], preferred_element_type=jnp.float32)
        h = h + b_refs[li][...]                  # f32 bias onto f32 accumulator
        if li < num_layers - 1:
            h = jnp.maximum(h, 0.0).astype(op_dtype)      # ReLU (VPU)

    # Re-read the input block for the residual (no long f32 live range) and
    # branch on `reverse` at trace time (no full-tile sign multiply).
    xf = x_ref[...].astype(jnp.float32)
    out = xf - h if reverse else xf + h
    y_ref[...] = out.astype(y_ref.dtype)


# ---------------------------------------------------------------------------
# Sizing helpers
# ---------------------------------------------------------------------------
_LANE = 128
_SINGLE_BUFFER_WEIGHTS = {"supported": None}   # cached probe of pl.Buffered(1)


def _round_up(v, m):
    return ((v + m - 1) // m) * m


def _cdiv(a, b):
    return -(-a // b)


def _pad_to(a, shape):
    pads = [(0, t - s) for s, t in zip(a.shape, shape)]
    if all(p == (0, 0) for p in pads):
        return a
    return jnp.pad(a, pads)


def _vmem_capacity_bytes():
    try:
        return int(pltpu.get_tpu_info().vmem_capacity_bytes)
    except Exception:
        return 64 << 20          # conservative (v7x per-core) fallback


def _choose_tile_b(B, D, max_width, weight_bytes, itemsize):
    """Generation-aware batch tile: big enough to amortize per-step overhead,
    small enough for VMEM, and >= 4 grid steps (2 per TC on v7x) when B permits."""
    vmem_cap = _vmem_capacity_bytes()
    budget = max(0, vmem_cap - 2 * weight_bytes) // 2     # generous headroom
    per_row = 4 * D * itemsize + 2 * max_width * 4        # 2x2 x/y bufs + f32 acts
    cap = budget // per_row if per_row else 512
    cap = int(max(8, min(2048, cap)))
    cap = (cap // 8) * 8

    t = _round_up(_cdiv(B, 4), 8)                          # aim for >= 4 steps
    t = max(8, min(t, cap, _round_up(B, 8)))
    return t


def _vmem_limit_bytes(tile_b, D, max_width, weight_bytes, itemsize, weight_bufs):
    io = 4 * tile_b * D * itemsize                # x + y, double-buffered
    acts = 4 * tile_b * max_width * 4             # f32 intermediates slack
    est = io + weight_bufs * weight_bytes + acts + (2 << 20)
    return int(min(_vmem_capacity_bytes(), max(32 << 20, est)))


# ---------------------------------------------------------------------------
# Wrapper
# ---------------------------------------------------------------------------
def additive_coupling_forward(x, log_det_J, weights, biases, *, mask_config,
                              reverse=False, tile_b=None, compute_dtype=None):
    """Pallas implementation of AdditiveCoupling.forward.

    Args:
      x:            (B, in_out_dim) float32, in_out_dim even.
      log_det_J:    scalar, passed through unchanged (as in the PyTorch module).
      weights:      list of (in, out) weight matrices (hidden + 1 of them).
      biases:       list of (1, out) biases.
      mask_config:  0 -> transform even units, 1 -> transform odd units.
      reverse:      subtract instead of add.
      tile_b:       rows per grid step; default is generation-aware.
      compute_dtype: e.g. jnp.bfloat16 for bf16 MXU operands (~3x MXU
                    throughput on v5e/v6e/v7x, f32 accumulation kept).
                    None keeps full-f32 matmuls (exact to 1e-4 vs reference).
    """
    B, D = x.shape
    assert D % 2 == 0, "odd in_out_dim not supported"
    num_layers = len(weights)
    assert num_layers >= 2 and len(biases) == num_layers

    # --- One-time weight prep (plain JAX, outside the kernel) ---------------
    # Fold de-interleave into layer 0 (zero rows at untouched parity) and
    # re-interleave into the last layer (zero cols / bias).
    w_first = jnp.zeros((D, weights[0].shape[1]), weights[0].dtype
                        ).at[mask_config::2, :].set(weights[0])
    w_last = jnp.zeros((weights[-1].shape[0], D), weights[-1].dtype
                       ).at[:, 1 - mask_config::2].set(weights[-1])
    b_last = jnp.zeros((1, D), biases[-1].dtype
                       ).at[:, 1 - mask_config::2].set(biases[-1])
    ws = [w_first] + list(weights[1:-1]) + [w_last]
    bs = list(biases[:-1]) + [b_last]

    # Zero-pad hidden widths to a lane multiple (exact: zero cols -> zero
    # pre-activations -> ReLU(0)=0 -> zero-row contribution downstream).
    in_dims = [D] + [_round_up(w.shape[1], _LANE) for w in ws[:-1]]
    out_dims = in_dims[1:] + [D]
    ws = [_pad_to(w, (ci, co)) for w, ci, co in zip(ws, in_dims, out_dims)]
    bs = [_pad_to(b, (1, co)) for b, co in zip(bs, out_dims)]

    # Pre-cast weights to the matmul operand dtype ONCE (halves weight HBM
    # traffic / VMEM residency for bf16; removes per-step in-kernel casts).
    op_dtype = jnp.float32 if compute_dtype is None else jnp.dtype(compute_dtype)
    ws = [w.astype(op_dtype) for w in ws]
    bs = [b.astype(jnp.float32) for b in bs]   # tiny; keep f32 for accuracy

    weight_bytes = (sum(w.size * w.dtype.itemsize for w in ws)
                    + sum(b.size * b.dtype.itemsize for b in bs))
    max_width = max(max(out_dims), D)
    itemsize = x.dtype.itemsize

    if tile_b is None:
        tile_b = _choose_tile_b(B, D, max_width, weight_bytes, itemsize)
    tile_b = max(1, min(int(tile_b), B))

    kernel = functools.partial(_coupling_kernel, reverse=bool(reverse),
                               num_layers=num_layers, op_dtype=op_dtype)

    grid = (pl.cdiv(B, tile_b),)
    row_map = lambda i: (i, 0)
    const_map = lambda i: (0, 0)

    flops = int(sum(2 * B * w.shape[0] * w.shape[1] for w in ws))
    bytes_accessed = int(2 * B * D * itemsize + weight_bytes)
    cost = pl.CostEstimate(flops=flops, transcendentals=0,
                           bytes_accessed=bytes_accessed)

    flat_args = [x] + [a for pair in zip(ws, bs) for a in pair]

    def _build(single_buffer_weights):
        in_specs = [pl.BlockSpec((tile_b, D), row_map)]
        for w, b in zip(ws, bs):
            if single_buffer_weights:
                # Grid-invariant blocks: fetched once; single buffer halves
                # their VMEM footprint (critical at real NICE scale on v7x).
                in_specs.append(pl.BlockSpec(w.shape, const_map,
                                             pipeline_mode=pl.Buffered(1)))
                in_specs.append(pl.BlockSpec(b.shape, const_map,
                                             pipeline_mode=pl.Buffered(1)))
            else:
                in_specs.append(pl.BlockSpec(w.shape, const_map))
                in_specs.append(pl.BlockSpec(b.shape, const_map))
        weight_bufs = 1 if single_buffer_weights else 2
        return pl.pallas_call(
            kernel,
            out_shape=jax.ShapeDtypeStruct((B, D), x.dtype),
            grid_spec=pltpu.PrefetchScalarGridSpec(
                num_scalar_prefetch=0,
                grid=grid,
                in_specs=in_specs,
                out_specs=pl.BlockSpec((tile_b, D), row_map),
            ),
            compiler_params=pltpu.CompilerParams(
                dimension_semantics=("parallel",),
                vmem_limit_bytes=_vmem_limit_bytes(
                    tile_b, D, max_width, weight_bytes, itemsize, weight_bufs)),
            cost_estimate=cost,
        )

    if _SINGLE_BUFFER_WEIGHTS["supported"] is False:
        y = _build(False)(*flat_args)
    else:
        try:
            y = _build(True)(*flat_args)
            _SINGLE_BUFFER_WEIGHTS["supported"] = True
        except Exception:
            # Older jax without Buffered(1) support: fall back to defaults.
            _SINGLE_BUFFER_WEIGHTS["supported"] = False
            y = _build(False)(*flat_args)

    return y, log_det_J


# ---------------------------------------------------------------------------
# Synthetic params + pure-JAX reference
# ---------------------------------------------------------------------------
def init_params(key, in_dim, mid_dim, out_dim, hidden):
    """Deterministic synthetic init. Weights stored (in, out); hidden+1 linears."""
    sizes = [(in_dim, mid_dim)] + [(mid_dim, mid_dim)] * (hidden - 1) \
            + [(mid_dim, out_dim)]
    keys = jax.random.split(key, 2 * len(sizes))
    weights, biases = [], []
    for li, (fi, fo) in enumerate(sizes):
        scale = 1.0 / (float(fi) ** 0.5)
        weights.append(jax.random.uniform(keys[2 * li], (fi, fo), jnp.float32,
                                          minval=-scale, maxval=scale))
        biases.append(jax.random.uniform(keys[2 * li + 1], (1, fo), jnp.float32,
                                         minval=-scale, maxval=scale))
    return weights, biases


def _reference_forward(x, log_det_J, weights, biases, *, mask_config,
                       reverse=False):
    """Pure-JAX reference mirroring the PyTorch module."""
    B, D = x.shape
    x1 = x[:, mask_config::2]
    x2 = x[:, 1 - mask_config::2]
    h = x1
    for li, (w, b) in enumerate(zip(weights, biases)):
        h = h @ w + b
        if li < len(weights) - 1:
            h = jnp.maximum(h, 0.0)
    x2 = x2 - h if reverse else x2 + h
    ordered = [x1, x2] if mask_config == 0 else [x2, x1]
    return jnp.stack(ordered, axis=2).reshape(B, D), log_det_J


# ---------------------------------------------------------------------------
# Demo / self-test
# ---------------------------------------------------------------------------
if __name__ == "__main__":
    # Module config: in_out_dim=256 (even split -> 128/128), mid_dim=128,
    # hidden=3 (=> 4 Linear layers).  B=64 with the adaptive tile gives a
    # 4-step "parallel" grid (>= 2 steps per TensorCore on v7x).
    B, in_out_dim, mid_dim, hidden = 64, 256, 128, 3
    half = in_out_dim // 2

    key = jax.random.PRNGKey(0)
    kx, kp = jax.random.split(key)
    x = jax.random.normal(kx, (B, in_out_dim), jnp.float32)
    log_det_J = jnp.zeros((), jnp.float32)
    weights, biases = init_params(kp, half, mid_dim, half, hidden)

    # Default f32 operand path: exact to 1e-4 vs the reference.
    for mask_config in (0, 1):
        for reverse in (False, True):
            y, ldj = additive_coupling_forward(
                x, log_det_J, weights, biases,
                mask_config=mask_config, reverse=reverse)
            y = jax.block_until_ready(y)
            y_ref, _ = _reference_forward(
                x, log_det_J, weights, biases,
                mask_config=mask_config, reverse=reverse)
            assert jnp.allclose(y, y_ref, atol=1e-4, rtol=1e-4), (
                f"mismatch vs reference (mask={mask_config}, reverse={reverse})")
            assert ldj.shape == log_det_J.shape

    # Partial last batch tile (B not a multiple of tile_b).
    x_odd = x[:50]
    y, _ = additive_coupling_forward(x_odd, log_det_J, weights, biases,
                                     mask_config=0, reverse=False, tile_b=16)
    y = jax.block_until_ready(y)
    y_ref, _ = _reference_forward(x_odd, log_det_J, weights, biases,
                                  mask_config=0, reverse=False)
    assert jnp.allclose(y, y_ref, atol=1e-4, rtol=1e-4), "partial-tile mismatch"

    # Opt-in bf16 MXU-operand path (f32 accumulation), looser tolerance.
    y, _ = additive_coupling_forward(x, log_det_J, weights, biases,
                                     mask_config=0, reverse=False,
                                     compute_dtype=jnp.bfloat16)
    y = jax.block_until_ready(y)
    y_ref, _ = _reference_forward(x, log_det_J, weights, biases,
                                  mask_config=0, reverse=False)
    assert jnp.allclose(y, y_ref, atol=5e-2, rtol=5e-2), "bf16 path mismatch"

    print("KERNEL_OK")
</pallas_src>

<mosaic_0001>
module attributes {stable_mosaic.version = 11 : i64} {
  func.func @_coupling_kernel(%arg0: i32, %arg1: memref<16x256xf32, #tpu.memory_space<vmem>>, %arg2: memref<256x128xf32, #tpu.memory_space<vmem>>, %arg3: memref<1x128xf32, #tpu.memory_space<vmem>>, %arg4: memref<128x128xf32, #tpu.memory_space<vmem>>, %arg5: memref<1x128xf32, #tpu.memory_space<vmem>>, %arg6: memref<128x128xf32, #tpu.memory_space<vmem>>, %arg7: memref<1x128xf32, #tpu.memory_space<vmem>>, %arg8: memref<128x256xf32, #tpu.memory_space<vmem>>, %arg9: memref<1x256xf32, #tpu.memory_space<vmem>>, %arg10: memref<16x256xf32, #tpu.memory_space<vmem>>) attributes {dimension_semantics = [#tpu.dimension_semantics<parallel>], iteration_bounds = array<i64: 4>, scalar_prefetch = 0 : i64, scratch_operands = 0 : i64, tpu.core_type = #tpu.core_type<tc>, window_params = [{transform_indices = @transform_0, window_bounds = array<i64: 16, 256>}, {pipeline_mode = #tpu.pipeline_mode<synchronous>, transform_indices = @transform_1, window_bounds = array<i64: 256, 128>}, {pipeline_mode = #tpu.pipeline_mode<synchronous>, transform_indices = @transform_2, window_bounds = array<i64: 1, 128>}, {pipeline_mode = #tpu.pipeline_mode<synchronous>, transform_indices = @transform_3, window_bounds = array<i64: 128, 128>}, {pipeline_mode = #tpu.pipeline_mode<synchronous>, transform_indices = @transform_4, window_bounds = array<i64: 1, 128>}, {pipeline_mode = #tpu.pipeline_mode<synchronous>, transform_indices = @transform_5, window_bounds = array<i64: 128, 128>}, {pipeline_mode = #tpu.pipeline_mode<synchronous>, transform_indices = @transform_6, window_bounds = array<i64: 1, 128>}, {pipeline_mode = #tpu.pipeline_mode<synchronous>, transform_indices = @transform_7, window_bounds = array<i64: 128, 256>}, {pipeline_mode = #tpu.pipeline_mode<synchronous>, transform_indices = @transform_8, window_bounds = array<i64: 1, 256>}, {transform_indices = @transform_9, window_bounds = array<i64: 16, 256>}]} {
    %c0 = arith.constant 0 : index
    %c0_0 = arith.constant 0 : index
    %0 = vector.load %arg1[%c0, %c0_0] : memref<16x256xf32, #tpu.memory_space<vmem>>, vector<16x256xf32>
    %c0_1 = arith.constant 0 : index
    %c0_2 = arith.constant 0 : index
    %1 = vector.load %arg2[%c0_1, %c0_2] : memref<256x128xf32, #tpu.memory_space<vmem>>, vector<256x128xf32>
    %cst = arith.constant dense<0.000000e+00> : vector<16x128xf32>
    %2 = tpu.matmul %0, %1, %cst {dimension_numbers = #tpu.dot_dimension_numbers<[1], [0], [0], [1], [0, 0, 1, 1], [], []>} : vector<16x256xf32>, vector<256x128xf32>, vector<16x128xf32> -> vector<16x128xf32>
    %c0_3 = arith.constant 0 : index
    %c0_4 = arith.constant 0 : index
    %3 = vector.load %arg3[%c0_3, %c0_4] : memref<1x128xf32, #tpu.memory_space<vmem>>, vector<1x128xf32>
    %4 = vector.broadcast %3 : vector<1x128xf32> to vector<16x128xf32>
    %5 = arith.addf %2, %4 : vector<16x128xf32>
    %cst_5 = arith.constant 0.000000e+00 : f32
    %6 = vector.broadcast %cst_5 : f32 to vector<16x128xf32>
    %7 = arith.maximumf %5, %6 : vector<16x128xf32>
    %c0_6 = arith.constant 0 : index
    %c0_7 = arith.constant 0 : index
    %8 = vector.load %arg4[%c0_6, %c0_7] : memref<128x128xf32, #tpu.memory_space<vmem>>, vector<128x128xf32>
    %cst_8 = arith.constant dense<0.000000e+00> : vector<16x128xf32>
    %9 = tpu.matmul %7, %8, %cst_8 {dimension_numbers = #tpu.dot_dimension_numbers<[1], [0], [0], [1], [0, 0, 1, 1], [], []>} : vector<16x128xf32>, vector<128x128xf32>, vector<16x128xf32> -> vector<16x128xf32>
    %c0_9 = arith.constant 0 : index
    %c0_10 = arith.constant 0 : index
    %10 = vector.load %arg5[%c0_9, %c0_10] : memref<1x128xf32, #tpu.memory_space<vmem>>, vector<1x128xf32>
    %11 = vector.broadcast %10 : vector<1x128xf32> to vector<16x128xf32>
    %12 = arith.addf %9, %11 : vector<16x128xf32>
    %cst_11 = arith.constant 0.000000e+00 : f32
    %13 = vector.broadcast %cst_11 : f32 to vector<16x128xf32>
    %14 = arith.maximumf %12, %13 : vector<16x128xf32>
    %c0_12 = arith.constant 0 : index
    %c0_13 = arith.constant 0 : index
    %15 = vector.load %arg6[%c0_12, %c0_13] : memref<128x128xf32, #tpu.memory_space<vmem>>, vector<128x128xf32>
    %cst_14 = arith.constant dense<0.000000e+00> : vector<16x128xf32>
    %16 = tpu.matmul %14, %15, %cst_14 {dimension_numbers = #tpu.dot_dimension_numbers<[1], [0], [0], [1], [0, 0, 1, 1], [], []>} : vector<16x128xf32>, vector<128x128xf32>, vector<16x128xf32> -> vector<16x128xf32>
    %c0_15 = arith.constant 0 : index
    %c0_16 = arith.constant 0 : index
    %17 = vector.load %arg7[%c0_15, %c0_16] : memref<1x128xf32, #tpu.memory_space<vmem>>, vector<1x128xf32>
    %18 = vector.broadcast %17 : vector<1x128xf32> to vector<16x128xf32>
    %19 = arith.addf %16, %18 : vector<16x128xf32>
    %cst_17 = arith.constant 0.000000e+00 : f32
    %20 = vector.broadcast %cst_17 : f32 to vector<16x128xf32>
    %21 = arith.maximumf %19, %20 : vector<16x128xf32>
    %c0_18 = arith.constant 0 : index
    %c0_19 = arith.constant 0 : index
    %22 = vector.load %arg8[%c0_18, %c0_19] : memref<128x256xf32, #tpu.memory_space<vmem>>, vector<128x256xf32>
    %cst_20 = arith.constant dense<0.000000e+00> : vector<16x256xf32>
    %23 = tpu.matmul %21, %22, %cst_20 {dimension_numbers = #tpu.dot_dimension_numbers<[1], [0], [0], [1], [0, 0, 1, 1], [], []>} : vector<16x128xf32>, vector<128x256xf32>, vector<16x256xf32> -> vector<16x256xf32>
    %c0_21 = arith.constant 0 : index
    %c0_22 = arith.constant 0 : index
    %24 = vector.load %arg9[%c0_21, %c0_22] : memref<1x256xf32, #tpu.memory_space<vmem>>, vector<1x256xf32>
    %25 = vector.broadcast %24 : vector<1x256xf32> to vector<16x256xf32>
    %26 = arith.addf %23, %25 : vector<16x256xf32>
    %c0_23 = arith.constant 0 : index
    %c0_24 = arith.constant 0 : index
    %27 = vector.load %arg1[%c0_23, %c0_24] : memref<16x256xf32, #tpu.memory_space<vmem>>, vector<16x256xf32>
    %28 = arith.addf %27, %26 : vector<16x256xf32>
    %c0_25 = arith.constant 0 : index
    %c0_26 = arith.constant 0 : index
    %29 = vector.load %arg10[%c0_25, %c0_26] : memref<16x256xf32, #tpu.memory_space<vmem>>, vector<16x256xf32>
    tpu.vector_store %arg10[%c0_25, %c0_26], %28 {strides = array<i32>} : memref<16x256xf32, #tpu.memory_space<vmem>>, vector<16x256xf32>,
    return
  }
  func.func @transform_0(%arg0: i32) -> (i32, i32) {
    %c0_i32 = arith.constant 0 : i32
    %c0_i32_0 = arith.constant 0 : i32
    return %arg0, %c0_i32 : i32, i32
  }
  func.func @transform_1(%arg0: i32) -> (i32, i32) {
    %c0_i32 = arith.constant 0 : i32
    %c0_i32_0 = arith.constant 0 : i32
    %c0_i32_1 = arith.constant 0 : i32
    return %c0_i32, %c0_i32_0 : i32, i32
  }
  func.func @transform_2(%arg0: i32) -> (i32, i32) {
    %c0_i32 = arith.constant 0 : i32
    %c0_i32_0 = arith.constant 0 : i32
    %c0_i32_1 = arith.constant 0 : i32
    return %c0_i32, %c0_i32_0 : i32, i32
  }
  func.func @transform_3(%arg0: i32) -> (i32, i32) {
    %c0_i32 = arith.constant 0 : i32
    %c0_i32_0 = arith.constant 0 : i32
    %c0_i32_1 = arith.constant 0 : i32
    return %c0_i32, %c0_i32_0 : i32, i32
  }
  func.func @transform_4(%arg0: i32) -> (i32, i32) {
    %c0_i32 = arith.constant 0 : i32
    %c0_i32_0 = arith.constant 0 : i32
    %c0_i32_1 = arith.constant 0 : i32
    return %c0_i32, %c0_i32_0 : i32, i32
  }
  func.func @transform_5(%arg0: i32) -> (i32, i32) {
    %c0_i32 = arith.constant 0 : i32
    %c0_i32_0 = arith.constant 0 : i32
    %c0_i32_1 = arith.constant 0 : i32
    return %c0_i32, %c0_i32_0 : i32, i32
  }
  func.func @transform_6(%arg0: i32) -> (i32, i32) {
    %c0_i32 = arith.constant 0 : i32
    %c0_i32_0 = arith.constant 0 : i32
    %c0_i32_1 = arith.constant 0 : i32
    return %c0_i32, %c0_i32_0 : i32, i32
  }
  func.func @transform_7(%arg0: i32) -> (i32, i32) {
    %c0_i32 = arith.constant 0 : i32
    %c0_i32_0 = arith.constant 0 : i32
    %c0_i32_1 = arith.constant 0 : i32
    return %c0_i32, %c0_i32_0 : i32, i32
  }
  func.func @transform_8(%arg0: i32) -> (i32, i32) {
    %c0_i32 = arith.constant 0 : i32
    %c0_i32_0 = arith.constant 0 : i32
    %c0_i32_1 = arith.constant 0 : i32
    return %c0_i32, %c0_i32_0 : i32, i32
  }
  func.func @transform_9(%arg0: i32) -> (i32, i32) {
    %c0_i32 = arith.constant 0 : i32
    %c0_i32_0 = arith.constant 0 : i32
    return %arg0, %c0_i32 : i32, i32
  }
}

module attributes {stable_mosaic.version = 11 : i64} {
  func.func @_coupling_kernel(%arg0: i32, %arg1: memref<16x256xf32, #tpu.memory_space<vmem>>, %arg2: memref<256x128xf32, #tpu.memory_space<vmem>>, %arg3: memref<1x128xf32, #tpu.memory_space<vmem>>, %arg4: memref<128x128xf32, #tpu.memory_space<vmem>>, %arg5: memref<1x128xf32, #tpu.memory_space<vmem>>, %arg6: memref<128x128xf32, #tpu.memory_space<vmem>>, %arg7: memref<1x128xf32, #tpu.memory_space<vmem>>, %arg8: memref<128x256xf32, #tpu.memory_space<vmem>>, %arg9: memref<1x256xf32, #tpu.memory_space<vmem>>, %arg10: memref<16x256xf32, #tpu.memory_space<vmem>>) attributes {dimension_semantics = [#tpu.dimension_semantics<parallel>], iteration_bounds = array<i64: 4>, scalar_prefetch = 0 : i64, scratch_operands = 0 : i64, tpu.core_type = #tpu.core_type<tc>, window_params = [{transform_indices = @transform_0, window_bounds = array<i64: 16, 256>}, {pipeline_mode = #tpu.pipeline_mode<synchronous>, transform_indices = @transform_1, window_bounds = array<i64: 256, 128>}, {pipeline_mode = #tpu.pipeline_mode<synchronous>, transform_indices = @transform_2, window_bounds = array<i64: 1, 128>}, {pipeline_mode = #tpu.pipeline_mode<synchronous>, transform_indices = @transform_3, window_bounds = array<i64: 128, 128>}, {pipeline_mode = #tpu.pipeline_mode<synchronous>, transform_indices = @transform_4, window_bounds = array<i64: 1, 128>}, {pipeline_mode = #tpu.pipeline_mode<synchronous>, transform_indices = @transform_5, window_bounds = array<i64: 128, 128>}, {pipeline_mode = #tpu.pipeline_mode<synchronous>, transform_indices = @transform_6, window_bounds = array<i64: 1, 128>}, {pipeline_mode = #tpu.pipeline_mode<synchronous>, transform_indices = @transform_7, window_bounds = array<i64: 128, 256>}, {pipeline_mode = #tpu.pipeline_mode<synchronous>, transform_indices = @transform_8, window_bounds = array<i64: 1, 256>}, {transform_indices = @transform_9, window_bounds = array<i64: 16, 256>}]} {
    %c0 = arith.constant 0 : index
    %c0_0 = arith.constant 0 : index
    %0 = vector.load %arg1[%c0, %c0_0] : memref<16x256xf32, #tpu.memory_space<vmem>>, vector<16x256xf32>
    %c0_1 = arith.constant 0 : index
    %c0_2 = arith.constant 0 : index
    %1 = vector.load %arg2[%c0_1, %c0_2] : memref<256x128xf32, #tpu.memory_space<vmem>>, vector<256x128xf32>
    %cst = arith.constant dense<0.000000e+00> : vector<16x128xf32>
    %2 = tpu.matmul %0, %1, %cst {dimension_numbers = #tpu.dot_dimension_numbers<[1], [0], [0], [1], [0, 0, 1, 1], [], []>} : vector<16x256xf32>, vector<256x128xf32>, vector<16x128xf32> -> vector<16x128xf32>
    %c0_3 = arith.constant 0 : index
    %c0_4 = arith.constant 0 : index
    %3 = vector.load %arg3[%c0_3, %c0_4] : memref<1x128xf32, #tpu.memory_space<vmem>>, vector<1x128xf32>
    %4 = vector.broadcast %3 : vector<1x128xf32> to vector<16x128xf32>
    %5 = arith.addf %2, %4 : vector<16x128xf32>
    %cst_5 = arith.constant 0.000000e+00 : f32
    %6 = vector.broadcast %cst_5 : f32 to vector<16x128xf32>
    %7 = arith.maximumf %5, %6 : vector<16x128xf32>
    %c0_6 = arith.constant 0 : index
    %c0_7 = arith.constant 0 : index
    %8 = vector.load %arg4[%c0_6, %c0_7] : memref<128x128xf32, #tpu.memory_space<vmem>>, vector<128x128xf32>
    %cst_8 = arith.constant dense<0.000000e+00> : vector<16x128xf32>
    %9 = tpu.matmul %7, %8, %cst_8 {dimension_numbers = #tpu.dot_dimension_numbers<[1], [0], [0], [1], [0, 0, 1, 1], [], []>} : vector<16x128xf32>, vector<128x128xf32>, vector<16x128xf32> -> vector<16x128xf32>
    %c0_9 = arith.constant 0 : index
    %c0_10 = arith.constant 0 : index
    %10 = vector.load %arg5[%c0_9, %c0_10] : memref<1x128xf32, #tpu.memory_space<vmem>>, vector<1x128xf32>
    %11 = vector.broadcast %10 : vector<1x128xf32> to vector<16x128xf32>
    %12 = arith.addf %9, %11 : vector<16x128xf32>
    %cst_11 = arith.constant 0.000000e+00 : f32
    %13 = vector.broadcast %cst_11 : f32 to vector<16x128xf32>
    %14 = arith.maximumf %12, %13 : vector<16x128xf32>
    %c0_12 = arith.constant 0 : index
    %c0_13 = arith.constant 0 : index
    %15 = vector.load %arg6[%c0_12, %c0_13] : memref<128x128xf32, #tpu.memory_space<vmem>>, vector<128x128xf32>
    %cst_14 = arith.constant dense<0.000000e+00> : vector<16x128xf32>
    %16 = tpu.matmul %14, %15, %cst_14 {dimension_numbers = #tpu.dot_dimension_numbers<[1], [0], [0], [1], [0, 0, 1, 1], [], []>} : vector<16x128xf32>, vector<128x128xf32>, vector<16x128xf32> -> vector<16x128xf32>
    %c0_15 = arith.constant 0 : index
    %c0_16 = arith.constant 0 : index
    %17 = vector.load %arg7[%c0_15, %c0_16] : memref<1x128xf32, #tpu.memory_space<vmem>>, vector<1x128xf32>
    %18 = vector.broadcast %17 : vector<1x128xf32> to vector<16x128xf32>
    %19 = arith.addf %16, %18 : vector<16x128xf32>
    %cst_17 = arith.constant 0.000000e+00 : f32
    %20 = vector.broadcast %cst_17 : f32 to vector<16x128xf32>
    %21 = arith.maximumf %19, %20 : vector<16x128xf32>
    %c0_18 = arith.constant 0 : index
    %c0_19 = arith.constant 0 : index
    %22 = vector.load %arg8[%c0_18, %c0_19] : memref<128x256xf32, #tpu.memory_space<vmem>>, vector<128x256xf32>
    %cst_20 = arith.constant dense<0.000000e+00> : vector<16x256xf32>
    %23 = tpu.matmul %21, %22, %cst_20 {dimension_numbers = #tpu.dot_dimension_numbers<[1], [0], [0], [1], [0, 0, 1, 1], [], []>} : vector<16x128xf32>, vector<128x256xf32>, vector<16x256xf32> -> vector<16x256xf32>
    %c0_21 = arith.constant 0 : index
    %c0_22 = arith.constant 0 : index
    %24 = vector.load %arg9[%c0_21, %c0_22] : memref<1x256xf32, #tpu.memory_space<vmem>>, vector<1x256xf32>
    %25 = vector.broadcast %24 : vector<1x256xf32> to vector<16x256xf32>
    %26 = arith.addf %23, %25 : vector<16x256xf32>
    %c0_23 = arith.constant 0 : index
    %c0_24 = arith.constant 0 : index
    %27 = vector.load %arg1[%c0_23, %c0_24] : memref<16x256xf32, #tpu.memory_space<vmem>>, vector<16x256xf32>
    %28 = arith.addf %27, %26 : vector<16x256xf32>
    %c0_25 = arith.constant 0 : index
    %c0_26 = arith.constant 0 : index
    %29 = vector.load %arg10[%c0_25, %c0_26] : memref<16x256xf32, #tpu.memory_space<vmem>>, vector<16x256xf32>
    tpu.vector_store %arg10[%c0_25, %c0_26], %28 {strides = array<i32>} : memref<16x256xf32, #tpu.memory_space<vmem>>, vector<16x256xf32>,
    return
  }
  func.func @transform_0(%arg0: i32) -> (i32, i32) {
    %c0_i32 = arith.constant 0 : i32
    %c0_i32_0 = arith.constant 0 : i32
    return %arg0, %c0_i32 : i32, i32
  }
  func.func @transform_1(%arg0: i32) -> (i32, i32) {
    %c0_i32 = arith.constant 0 : i32
    %c0_i32_0 = arith.constant 0 : i32
    %c0_i32_1 = arith.constant 0 : i32
    return %c0_i32, %c0_i32_0 : i32, i32
  }
  func.func @transform_2(%arg0: i32) -> (i32, i32) {
    %c0_i32 = arith.constant 0 : i32
    %c0_i32_0 = arith.constant 0 : i32
    %c0_i32_1 = arith.constant 0 : i32
    return %c0_i32, %c0_i32_0 : i32, i32
  }
  func.func @transform_3(%arg0: i32) -> (i32, i32) {
    %c0_i32 = arith.constant 0 : i32
    %c0_i32_0 = arith.constant 0 : i32
    %c0_i32_1 = arith.constant 0 : i32
    return %c0_i32, %c0_i32_0 : i32, i32
  }
  func.func @transform_4(%arg0: i32) -> (i32, i32) {
    %c0_i32 = arith.constant 0 : i32
    %c0_i32_0 = arith.constant 0 : i32
    %c0_i32_1 = arith.constant 0 : i32
    return %c0_i32, %c0_i32_0 : i32, i32
  }
  func.func @transform_5(%arg0: i32) -> (i32, i32) {
    %c0_i32 = arith.constant 0 : i32
    %c0_i32_0 = arith.constant 0 : i32
    %c0_i32_1 = arith.constant 0 : i32
    return %c0_i32, %c0_i32_0 : i32, i32
  }
  func.func @transform_6(%arg0: i32) -> (i32, i32) {
    %c0_i32 = arith.constant 0 : i32
    %c0_i32_0 = arith.constant 0 : i32
    %c0_i32_1 = arith.constant 0 : i32
    return %c0_i32, %c0_i32_0 : i32, i32
  }
  func.func @transform_7(%arg0: i32) -> (i32, i32) {
    %c0_i32 = arith.constant 0 : i32
    %c0_i32_0 = arith.constant 0 : i32
    %c0_i32_1 = arith.constant 0 : i32
    return %c0_i32, %c0_i32_0 : i32, i32
  }
  func.func @transform_8(%arg0: i32) -> (i32, i32) {
    %c0_i32 = arith.constant 0 : i32
    %c0_i32_0 = arith.constant 0 : i32
    %c0_i32_1 = arith.constant 0 : i32
    return %c0_i32, %c0_i32_0 : i32, i32
  }
  func.func @transform_9(%arg0: i32) -> (i32, i32) {
    %c0_i32 = arith.constant 0 : i32
    %c0_i32_0 = arith.constant 0 : i32
    return %arg0, %c0_i32 : i32, i32
  }
}

</mosaic_0001>

<bundles_post_ra>
// kernel: tpu_custom_call.1
= control target key start
LH: loop header
LB: loop body
LE: loop exit
PB: predicated region body
PF: predicated region fallthrough
CT: control target
= control target key end

     0   :  { %s1993_s0 = inlined_call_operand.hbm [shape: f32[64,256], index: 0, kind: input, shape index: {}]   ;;  %s1994_s1 = inlined_call_operand.hbm [shape: f32[256,128], index: 1, kind: input, shape index: {}]   ;;  %s1995_s2 = inlined_call_operand.vmem [shape: f32[1,128], index: 2, kind: input, shape index: {}]   ;;  %s1996_s3 = inlined_call_operand.hbm [shape: f32[128,128], index: 3, kind: input, shape index: {}]   ;;  %s1997_s4 = inlined_call_operand.vmem [shape: f32[1,128], index: 4, kind: input, shape index: {}]   ;;  %s1998_s5 = inlined_call_operand.hbm [shape: f32[128,128], index: 5, kind: input, shape index: {}]   ;;  %s1999_s6 = inlined_call_operand.vmem [shape: f32[1,128], index: 6, kind: input, shape index: {}]   ;;  %s2000_s7 = inlined_call_operand.hbm [shape: f32[128,256], index: 7, kind: input, shape index: {}]   ;;  %s2001_s8 = inlined_call_operand.vmem [shape: f32[1,256], index: 8, kind: input, shape index: {}]   ;;  %s2002_s9 = inlined_call_operand.hbm [shape: f32[64,256], index: 9, kind: output, shape index: {}]  }
   0x1   :  { %2009 = sst [smem:[#allocation18_spill]] %s2002_s9 }
   0x2   :  { %14 = vsyncpa [#allocation3], 0 }
   0x3   :  { %16 = vsyncpa [#allocation3 + $0x1], 0 }
   0x4   :  { %17 = vsyncpa [#allocation6], 0 }
   0x5   :  { %18 = vsyncpa [#allocation9], 0 }
   0x6   :  { %19 = vsyncpa [#allocation4], 0 }
   0x7   :  { %21 = vsyncpa [#allocation4 + $0x1], 0  ;;  %s1665_s30 = smov 0   ;;  %s1667_s10 = smov 0  }
   0x8   :  { %s1669_s11 = smov 0   ;;  %s1671_s12 = smov 0  }
   0x9 LB: > { %2010 = sst [smem:[#allocation16_spill]] %s1588_s30  ;;  %s1686_s13 = sadd.s32 4294967295, %s1600_s12   ;;  %s1600_s12 = sphi %s1671_s12, %s2033_s12   ;;  %s1596_s11 = sphi %s1669_s11, %s2032_s11   ;;  %s1592_s10 = sphi %s1667_s10, %s2031_s10   ;;  %s1588_s30 = sphi %s1665_s30, %s2030_s30  }
   0xa   : > { %s987_s14 = sadd.s32 4294967294, %s1600_s12   ;;  %p47_p0 = scmp.ne.s32.totalorder %s1592_s10, %s1588_s30 }
   0xb   : > { %p2003_p1 = scmp.eq.s32.totalorder %s1686_s13, 0  ;;  %p245_p3 = scmp.eq.s32.totalorder %s987_s14, 3 }
   0xc   : > { %p988_p5 = scmp.ge.s32.totalorder %s1600_s12, 1  ;;  %p252_p7 = scmp.lt.s32.totalorder %s1600_s12, 5 }
   0xd   : > { %p1695_p4 = por %p2003_p1, %p47_p0  ;;  %p1700_p6 = por %p245_p3, %p47_p0 }
   0xe   : > { %p1705_p8 = pnand %p988_p5, %p252_p7  ;;  %s1602_s18 = smov [#allocation5]  }
   0xf   : > { %s2011_s15 = scalar_select %p1695_p4, 1, 0 }
  0x10   : > { %s2012_s16 = scalar_select %p1700_p6, 1, 0 }
  0x11   : > { %s2014_s17 = scalar_select %p1705_p8, 1, 0 }
  0x12   : > { %2013 = sst [smem:[#allocation17_spill]] %s2012_s16  ;;  %s264_s19 = sshll.u32 %s1602_s18, 4  ;;  %s1709_s19 = int_to_ptr.vmem [resolvable:$true] %s264_s19 }
  0x13   : > { %p1310_p9 = pneg %p1705_p8  ;;  %s1603_s21 = smov [#allocation8]  }
  0x14   : > { %s296_s22 = sshll.u32 %s1603_s21, 4  ;;  %s1604_s23 = smov [#allocation7]   ;;  %s1719_s22 = int_to_ptr.vmem [resolvable:$true] %s296_s22 }
  0x15   : > { %p1715_p10 = pnand %p1310_p9, %p2003_p1  ;;  %s1721_s24 = sshll.u32 %s1604_s23, 4  ;;  %s281_s24 = int_to_ptr.vmem [resolvable:$true] %s1721_s24 }
  0x16   : > { %s1384_s27 = scalar_lea.hbm %s1994_s1, 4096 }
  0x17   : > { %p1385_p11 = scmp.ne.s32.totalorder %s1994_s1, %s1384_s27  ;;  %p1731_p12 = pneg %p1715_p10 }
  0x18   : > { %p1391_p3 = scmp.lt.u32.totalorder %s1384_s27, %s1994_s1 }
  0x19   : > { %p1387_p13 = pnand %p1731_p12, %p1385_p11 }
  0x1b   : > { %p1388_p0 = pneg %p1387_p13 }
  0x1d   : > { %p1393_p5 = pnand %p1391_p3, %p1388_p0 }
  0x1f   : > { %1396 = shalt.err (!%p1393_p5)
}
  0x20   : > { %s1397_s23 = scalar_lea.vmem %s1709_s19, 4096  ;;  %p1405_p2 = scmp.lt.s32.totalorder %s1709_s19, %s1709_s19 }
  0x21   : > { %p1398_p7 = scmp.ne.s32.totalorder %s1709_s19, %s1397_s23  ;;  %p1406_p6 = scmp.lt.s32.totalorder %s1397_s23, %s1397_s23 }
  0x23   : > { %p1400_p9 = pnand %p1398_p7, %p1731_p12  ;;  %p1407_p11 = por %p1406_p6, %p1405_p2 }
  0x25   : > { %p1401_p1 = pneg %p1400_p9 }
  0x27   : > { %p1408_p13 = pnand %p1407_p11, %p1401_p1 }
  0x29   : > { %1411 = shalt.err (!%p1408_p13)
}
  0x2a   : > { %s1605_s25 = smov 128   ;;  %s1606_s26 = smov 8  }
  0x2b   : > { %1313 = dma.hbm_to_vmem [thread:$0]  (!%p1715_p10), %s1994_s1, 4096, %s1709_s19, [#allocation6], %s1605_s25, %s1605_s25, %s1606_s26  }
  0x2c   : > { %s1412_s21 = scalar_lea.hbm %s1998_s5, 2048 }
  0x2d   : > { %p1413_p1 = scmp.ne.s32.totalorder %s1998_s5, %s1412_s21  ;;  %p1419_p0 = scmp.lt.u32.totalorder %s1412_s21, %s1998_s5 }
  0x2f   : > { %p1415_p2 = pnand %p1413_p1, %p1731_p12 }
  0x31   : > { %p1416_p6 = pneg %p1415_p2 }
  0x33   : > { %p1421_p3 = pnand %p1419_p0, %p1416_p6 }
  0x35   : > { %1424 = shalt.err (!%p1421_p3)
}
  0x36   : > { %s1425_s19 = scalar_lea.vmem %s1719_s22, 2048  ;;  %p1433_p11 = scmp.lt.s32.totalorder %s1719_s22, %s1719_s22 }
  0x37   : > { %p1426_p5 = scmp.ne.s32.totalorder %s1719_s22, %s1425_s19  ;;  %p1434_p13 = scmp.lt.s32.totalorder %s1425_s19, %s1425_s19 }
  0x39   : > { %p1428_p7 = pnand %p1426_p5, %p1731_p12  ;;  %p1435_p1 = por %p1434_p13, %p1433_p11 }
  0x3b   : > { %p1429_p9 = pneg %p1428_p7 }
  0x3d   : > { %p1436_p2 = pnand %p1435_p1, %p1429_p9 }
  0x3f   : > { %1439 = shalt.err (!%p1436_p2)
}
  0x40   : > { %1319 = dma.hbm_to_vmem [thread:$0]  (!%p1715_p10), %s1998_s5, 2048, %s1719_s22, [#allocation9], %s1605_s25, %s1605_s25, %s1606_s26  }
  0x41   : > { %s1440_s28 = scalar_lea.hbm %s1996_s3, 2048 }
  0x42   : > { %p1441_p6 = scmp.ne.s32.totalorder %s1996_s3, %s1440_s28  ;;  %p1447_p5 = scmp.lt.u32.totalorder %s1440_s28, %s1996_s3 }
  0x44   : > { %p1443_p0 = pnand %p1441_p6, %p1731_p12 }
  0x46   : > { %p1444_p3 = pneg %p1443_p0 }
  0x48   : > { %p1449_p7 = pnand %p1447_p5, %p1444_p3 }
  0x4a   : > { %1452 = shalt.err (!%p1449_p7)
}
  0x4b   : > { %s1453_s19 = scalar_lea.vmem %s281_s24, 2048  ;;  %p1461_p1 = scmp.lt.s32.totalorder %s281_s24, %s281_s24 }
  0x4c   : > { %p1454_p9 = scmp.ne.s32.totalorder %s281_s24, %s1453_s19  ;;  %p1462_p2 = scmp.lt.s32.totalorder %s1453_s19, %s1453_s19 }
  0x4e   : > { %p1456_p11 = pnand %p1454_p9, %p1731_p12  ;;  %p1463_p4 = por %p1462_p2, %p1461_p1 }
  0x50   : > { %p1457_p13 = pneg %p1456_p11 }
  0x52   : > { %p1464_p8 = pnand %p1463_p4, %p1457_p13 }
  0x54   : > { %1467 = shalt.err (!%p1464_p8)
}
  0x55   : > { %1316 = dma.hbm_to_vmem [thread:$0]  (!%p1715_p10), %s1996_s3, 2048, %s281_s24, [#allocation6], %s1605_s25, %s1605_s25, %s1606_s26  }
  0x56   : > { %s1607_s30 = smov [#allocation10]   ;;  %s1468_s29 = scalar_lea.hbm %s2000_s7, 4096 }
  0x57   : > { %s312_s16 = sshll.u32 %s1607_s30, 4  ;;  %p1469_p4 = scmp.ne.s32.totalorder %s2000_s7, %s1468_s29  ;;  %s313_s16 = int_to_ptr.vmem [resolvable:$true] %s312_s16 }
  0x58   : > { %p1475_p0 = scmp.lt.u32.totalorder %s1468_s29, %s2000_s7 }
  0x59   : > { %p1471_p8 = pnand %p1469_p4, %p1731_p12 }
  0x5b   : > { %p1472_p6 = pneg %p1471_p8 }
  0x5d   : > { %p1477_p3 = pnand %p1475_p0, %p1472_p6 }
  0x5f   : > { %1480 = shalt.err (!%p1477_p3)
}
  0x60   : > { %s1481_s24 = scalar_lea.vmem %s313_s16, 4096  ;;  %p1489_p11 = scmp.lt.s32.totalorder %s313_s16, %s313_s16 }
  0x61   : > { %p1482_p5 = scmp.ne.s32.totalorder %s313_s16, %s1481_s24  ;;  %p1490_p13 = scmp.lt.s32.totalorder %s1481_s24, %s1481_s24 }
  0x63   : > { %p1484_p7 = pnand %p1482_p5, %p1731_p12  ;;  %p1491_p1 = por %p1490_p13, %p1489_p11 }
  0x65   : > { %p1485_p9 = pneg %p1484_p7 }
  0x67   : > { %p1492_p2 = pnand %p1491_p1, %p1485_p9 }
  0x69   : > { %1495 = shalt.err (!%p1492_p2)
}
  0x6a   : > { %s1608_s25 = smov 256   ;;  %s1609_s14 = smov 16  }
  0x6b   : > { %1322 = dma.hbm_to_vmem [thread:$0]  (!%p1715_p10), %s2000_s7, 4096, %s313_s16, [#allocation9], %s1608_s25, %s1608_s25, %s1609_s14  }
  0x6c   : > { %s1825_s9 = sadd.s32 1, %s1600_s12   ;;  %s34_s27 = sadd.s32 1, %s1596_s11 }
  0x6d   : > { %s31_s30 = ssub.s32 %s1600_s12, %s1825_s9  ;;  %p41_p4 = scmp.ne.s32.totalorder %s1596_s11, %s1592_s10 }
  0x6e   : > { %p32_p12 = scmp.eq.s32.totalorder %s31_s30, 0  ;;  %p42_p8 = scmp.eq.s32.totalorder %s1600_s12, 0 }
  0x6f   : > { %p2017_p0 = scmp.eq.s32.totalorder %s1686_s13, 3  ;;  %p1335_p5 = scmp.lt.s32.totalorder %s1600_s12, 4 }
  0x70   : > { %s1834_s28 = scalar_select %p32_p12, %s1596_s11, %s34_s27  }
  0x71   : > { %p43_p6 = por %p42_p8, %p41_p4  ;;  %p1838_p3 = por %p2017_p0, %p41_p4 }
  0x72   : > { %s329_s29 = sand.u32 1, %s1596_s11   ;;  %s1015_s16 = sshll.u32 %s1600_s12, 9 }
  0x73   : > { %s994_s18 = sshll.u32 %s329_s29, 5  ;;  %s1848_s19 = scalar_lea.hbm %s1993_s0, %s1015_s16 }
  0x74   : > { %s333_s24 = scalar_lea.vmem [#allocation2], %s994_s18  ;;  %p1852_p10 = pnand %p1335_p5, %p43_p6 }
  0x75   : > { %s341_s26 = sshll.u32 %s333_s24, 4  ;;  %s1856_s30 = scalar_lea.sflag [#allocation3], %s329_s29  ;;  %s1850_s26 = int_to_ptr.vmem [resolvable:$true] %s341_s26 }
  0x76   : > { %s1496_s27 = scalar_lea.hbm %s1848_s19, 512  ;;  %p1498_p9 = pneg %p1852_p10 }
  0x77   : > { %p1497_p7 = scmp.ne.s32.totalorder %s1848_s19, %s1496_s27  ;;  %s1501_s21 = scalar_lea.hbm %s1993_s0, 2048 }
  0x78   : > { %p1502_p1 = scmp.lt.u32.totalorder %s1848_s19, %s1993_s0  ;;  %p1503_p2 = scmp.lt.u32.totalorder %s1501_s21, %s1496_s27 }
  0x79   : > { %p1499_p11 = pnand %p1498_p9, %p1497_p7  ;;  %p1505_p4 = scmp.lt.u32.totalorder %s1496_s27, %s1848_s19 }
  0x7a   : > { %p1504_p12 = por %p1503_p2, %p1502_p1 }
  0x7b   : > { %p1500_p13 = pneg %p1499_p11 }
  0x7c   : > { %p1506_p8 = por %p1505_p4, %p1504_p12 }
  0x7e   : > { %p1507_p6 = pnand %p1506_p8, %p1500_p13 }
  0x80   : > { %1510 = shalt.err (!%p1507_p6)
}
  0x81   : > { %s1511_s29 = scalar_lea.vmem %s1850_s26, 512  ;;  %s1610_s18 = smov [#allocation2]  }
  0x82   : > { %p1512_p0 = scmp.ne.s32.totalorder %s1850_s26, %s1511_s29  ;;  %s1516_s16 = sshll.u32 %s1610_s18, 4  ;;  %s1517_s16 = int_to_ptr.vmem [resolvable:$false] %s1516_s16 }
  0x83   : > { %s1518_s23 = scalar_lea.vmem %s1517_s16, 1024  ;;  %p1519_p11 = scmp.lt.s32.totalorder %s1850_s26, %s1517_s16 }
  0x84   : > { %p1514_p5 = pnand %p1512_p0, %p1498_p9  ;;  %p1520_p1 = scmp.lt.s32.totalorder %s1518_s23, %s1511_s29 }
  0x86   : > { %p1515_p7 = pneg %p1514_p5  ;;  %p1521_p2 = por %p1520_p1, %p1519_p11 }
  0x88   : > { %p1522_p12 = pnand %p1521_p2, %p1515_p7 }
  0x8a   : > { %1525 = shalt.err (!%p1522_p12)
}
  0x8b   : > { %1326 = dma.hbm_to_vmem [thread:$0]  (!%p1852_p10), %s1848_s19, 512, %s1850_s26, %s1856_s30, %s1608_s25, %s1608_s25, %s1609_s14  }
  0x8c   : > { %p2020_p9 = scmp.ne.s32.totalorder %s2014_s17, 0 }
  0x8d   : > { %s1890_s27 = sand.u32 (!%p2020_p9), 1, %s1592_s10   ;;  %p2021_p13 = scmp.ne.s32.totalorder (!%p2020_p9), %s2011_s15, 0 }
  0x8e   : > { %353 = sbr.rel (%p2020_p9) target bundleno = 1086 (0x43e), region = 56  ;;  %s999_s21 = sshll.u32 (!%p2020_p9), %s1890_s27, 5 }
  0x8f   : > { %s356_s24 = scalar_lea.sflag (!%p2020_p9), [#allocation3], %s1890_s27  ;;  %s1896_s22 = scalar_lea.vmem (!%p2020_p9), [#allocation2], %s999_s21 }
  0x95   : > { %1571 = dma.done.wait (%p2021_p13), %s356_s24, 512  }
  0x96   : > { %1573 = vsyncadd (%p2021_p13), %s356_s24, 4294966784  ;;  %p2022_p10 = scmp.eq.s32.totalorder %s1686_s13, 0 }
  0x98   : > { %1575 = dma.done.wait (%p2022_p10), [#allocation6], 6144   ;;  %p2023_p4 = pmov %p2022_p10 }
  0x9a   : > { %1577 = vsyncadd (%p2023_p4), [#allocation6], 4294961152  ;;  %p2024_p8 = pmov %p2023_p4 }
  0x9b   : > { %p2025_p6 = pmov %p2023_p4 }
  0x9c   : > { %1579 = dma.done.wait (%p2024_p8), [#allocation9], 6144  }
  0x9d   : > { %1581 = vsyncadd (%p2025_p6), [#allocation9], 4294961152  ;;  %v432_v0 = vld [vmem:[#allocation5 + $0x80] sm:$0xff]  ;;  %v433_v1 = vld [vmem:[#allocation5 + $0x88] sm:$0xff]  ;;  %s409_s18 = scalar_lea.vmem [#allocation11], %s999_s21  ;;  %s1017_s23 = sshll.u32 %s1686_s13, 9 }
  0x9e   : > { %v416_v2 = vld [vmem:[#allocation5] sm:$0xff]  ;;  %v1162_v3 = vpack.c.bf16 %v433_v1, %v432_v0  ;;  %v417_v4 = vld [vmem:[#allocation5 + $0x8] sm:$0xff]  ;;  %v434_v5 = vld [vmem:[#allocation5 + $0x90] sm:$0xff]  ;;  %s876_s16 = sshll.u32 %s409_s18, 4  ;;  %s862_s13 = scalar_lea.sflag [#allocation4], %s1890_s27  ;;  %s1943_s16 = int_to_ptr.vmem [resolvable:$true] %s876_s16 }
  0x9f   : > { %v435_v6 = vld [vmem:[#allocation5 + $0x98] sm:$0xff]  ;;  %v1164_v7 = vpack.c.bf16 %v417_v4, %v416_v2  ;;  %v418_v9 = vld [vmem:[#allocation5 + $0x10] sm:$0xff]  ;;  %v436_v11 = vld [vmem:[#allocation5 + $0xa0] sm:$0xff]  ;;  %s1526_s17 = scalar_lea.vmem %s1943_s16, 512  ;;  %s1612_s25 = smov [#allocation11]  }
  0xa0   : > { %v1166_v8 = vpack.c.bf16 %v435_v6, %v434_v5  ;;  %v419_v10 = vld [vmem:[#allocation5 + $0x18] sm:$0xff]  ;;  %1163 = vmatprep.subr.bf16.mxu0 %v1162_v3  ;;  %v437_v12 = vld [vmem:[#allocation5 + $0xa8] sm:$0xff]  ;;  %v420_v15 = vld [vmem:[#allocation5 + $0x20] sm:$0xff]  ;;  %p1527_p0 = scmp.ne.s32.totalorder %s1943_s16, %s1526_s17  ;;  %s1530_s14 = sshll.u32 %s1612_s25, 4  ;;  %s1531_s14 = int_to_ptr.vmem [resolvable:$false] %s1530_s14 }
  0xa1   : > { %1165 = vmatpush3.bf16.msra.mxu0 %v1164_v7  ;;  %v1168_v13 = vpack.c.bf16 %v419_v10, %v418_v9  ;;  %v1170_v14 = vpack.c.bf16 %v437_v12, %v436_v11  ;;  %v421_v16 = vld [vmem:[#allocation5 + $0x28] sm:$0xff]  ;;  %v438_v17 = vld [vmem:[#allocation5 + $0xb0] sm:$0xff]  ;;  %v439_v18 = vld [vmem:[#allocation5 + $0xb8] sm:$0xff]  ;;  %s1532_s19 = scalar_lea.vmem %s1531_s14, 1024  ;;  %p1533_p11 = scmp.lt.s32.totalorder %s1943_s16, %s1531_s14 }
  0xa2   : > { %1167 = vmatprep.subr.bf16.mxu0 %v1166_v8  ;;  %v1172_v19 = vpack.c.bf16 %v421_v16, %v420_v15  ;;  %v1174_v20 = vpack.c.bf16 %v439_v18, %v438_v17  ;;  %v422_v21 = vld [vmem:[#allocation5 + $0x30] sm:$0xff]  ;;  %v423_v22 = vld [vmem:[#allocation5 + $0x38] sm:$0xff]  ;;  %v440_v23 = vld [vmem:[#allocation5 + $0xc0] sm:$0xff]  ;;  %p1528_p5 = pnand %p1527_p0, %p1838_p3  ;;  %p1534_p1 = scmp.lt.s32.totalorder %s1532_s19, %s1526_s17 }
  0xa3   : > { %v441_v24 = vld [vmem:[#allocation5 + $0xc8] sm:$0xff]  ;;  %v424_v26 = vld [vmem:[#allocation5 + $0x40] sm:$0xff]  ;;  %v1176_v27 = vpack.c.bf16 %v423_v22, %v422_v21  ;;  %v534_v30 = vld [vmem:[#allocation7 + $0x10] sm:$0xff] }
  0xa4   : > { %v1911_v25 = vld [vmem:[%s1896_s22 + $0x8] sm:$0xff]  ;;  %v532_v28 = vld [vmem:[#allocation7] sm:$0xff]  ;;  %v1178_v31 = vpack.c.bf16 %v441_v24, %v440_v23  ;;  %v442_v33 = vld [vmem:[#allocation5 + $0xd0] sm:$0xff]  ;;  %p1529_p7 = pneg %p1528_p5  ;;  %p1535_p2 = por %p1534_p1, %p1533_p11 }
  0xa5   : > { %1169 = vmatpush3.bf16.msra.mxu0 %v1168_v13  ;;  %519 = vmatprep.mubr.f32.mxu0 %v1911_v25  ;;  %v533_v29 = vld [vmem:[#allocation7 + $0x8] sm:$0xff]  ;;  %v535_v35 = vld [vmem:[#allocation7 + $0x18] sm:$0xff]  ;;  %v536_v38 = vld [vmem:[#allocation7 + $0x20] sm:$0xff] }
  0xa6   : > { %1171 = vmatprep.subr.bf16.mxu0 %v1170_v14  ;;  %v425_v32 = vld [vmem:[#allocation5 + $0x48] sm:$0xff]  ;;  %v1194_v34 = vpack.c.bf16 %v533_v29, %v532_v28  ;;  %v443_v36 = vld [vmem:[#allocation5 + $0xd8] sm:$0xff]  ;;  %v1198_v37 = vpack.c.bf16 %v535_v35, %v534_v30  ;;  %v426_v42 = vld [vmem:[#allocation5 + $0x50] sm:$0xff]  ;;  %p1536_p12 = pnand %p1535_p2, %p1529_p7 }
  0xa7   : > { %v537_v39 = vld [vmem:[#allocation7 + $0x28] sm:$0xff]  ;;  %v1180_v40 = vpack.c.bf16 %v425_v32, %v424_v26  ;;  %v1182_v41 = vpack.c.bf16 %v443_v36, %v442_v33  ;;  %v427_v43 = vld [vmem:[#allocation5 + $0x58] sm:$0xff]  ;;  %v444_v44 = vld [vmem:[#allocation5 + $0xe0] sm:$0xff] }
  0xa8   : > { %1195 = vmatprep.subr.bf16.mxu1 %v1194_v34  ;;  %v1202_v45 = vpack.c.bf16 %v537_v39, %v536_v38  ;;  %v445_v46 = vld [vmem:[#allocation5 + $0xe8] sm:$0xff]  ;;  %v538_v47 = vld [vmem:[#allocation7 + $0x30] sm:$0xff]  ;;  %v539_v48 = vld [vmem:[#allocation7 + $0x38] sm:$0xff]  ;;  %v1184_v49 = vpack.c.bf16 %v427_v43, %v426_v42 }
  0xa9   : > { %1173 = vmatpush3.bf16.msra.mxu0 %v1172_v19  ;;  %1197 = vmatpush3.bf16.msra.mxu1 %v1194_v34  ;;  %v1186_v50 = vpack.c.bf16 %v445_v46, %v444_v44  ;;  %v428_v51 = vld [vmem:[#allocation5 + $0x60] sm:$0xff]  ;;  %v429_v52 = vld [vmem:[#allocation5 + $0x68] sm:$0xff]  ;;  %v446_v53 = vld [vmem:[#allocation5 + $0xf0] sm:$0xff]  ;;  %v1206_v54 = vpack.c.bf16 %v539_v48, %v538_v47 }
  0xaa   : > { %1175 = vmatprep.subr.bf16.mxu0 %v1174_v20  ;;  %1199 = vmatprep.subr.bf16.mxu1 %v1198_v37  ;;  %v447_v55 = vld [vmem:[#allocation5 + $0xf8] sm:$0xff]  ;;  %v540_v56 = vld [vmem:[#allocation7 + $0x40] sm:$0xff]  ;;  %v541_v57 = vld [vmem:[#allocation7 + $0x48] sm:$0xff]  ;;  %v1188_v58 = vpack.c.bf16 %v429_v52, %v428_v51 }
  0xab   : > { %v1190_v59 = vpack.c.bf16 %v447_v55, %v446_v53  ;;  %v430_v60 = vld [vmem:[#allocation5 + $0x70] sm:$0xff]  ;;  %v431_v61 = vld [vmem:[#allocation5 + $0x78] sm:$0xff]  ;;  %v1210_v62 = vpack.c.bf16 %v541_v57, %v540_v56  ;;  %v1915_v0 = vld [vmem:[%s1896_s22] sm:$0xff] }
  0xac   : > { %v1192_v63 = vpack.c.bf16 %v431_v61, %v430_v60  ;;  %v1918_v1 = vld [vmem:[%s1896_s22 + $0x18] sm:$0xff]  ;;  %v1923_v2 = vld [vmem:[%s1896_s22 + $0x10] sm:$0xff]  ;;  %v544_v6 = vld [vmem:[#allocation7 + $0x60] sm:$0xff]  ;;  %s2026_s22 = sld [smem:[#allocation18_spill]] }
  0xad   : > { %1177 = vmatpush3.bf16.msra.mxu0 %v1176_v27  ;;  %1201 = vmatpush3.bf16.msra.mxu1 %v1198_v37  ;;  %v542_v3 = vld [vmem:[#allocation7 + $0x50] sm:$0xff]  ;;  %v543_v4 = vld [vmem:[#allocation7 + $0x58] sm:$0xff]  ;;  %v545_v7 = vld [vmem:[#allocation7 + $0x68] sm:$0xff] }
  0xae   : > { %1179 = vmatprep.subr.bf16.mxu0 %v1178_v31  ;;  %1203 = vmatprep.subr.bf16.mxu1 %v1202_v45  ;;  %v1214_v5 = vpack.c.bf16 %v543_v4, %v542_v3  ;;  %v1218_v8 = vpack.c.bf16 %v545_v7, %v544_v6  ;;  %v546_v9 = vld [vmem:[#allocation7 + $0x70] sm:$0xff]  ;;  %v547_v10 = vld [vmem:[#allocation7 + $0x78] sm:$0xff]  ;;  %v632_v12 = vld [vmem:[#allocation8] sm:$0xff] }
  0xaf   : > { %v1222_v11 = vpack.c.bf16 %v547_v10, %v546_v9  ;;  %v633_v13 = vld [vmem:[#allocation8 + $0x8] sm:$0xff]  ;;  %v634_v14 = vld [vmem:[#allocation8 + $0x10] sm:$0xff]  ;;  %v635_v16 = vld [vmem:[#allocation8 + $0x18] sm:$0xff] }
  0xb0   : > { %v1226_v15 = vpack.c.bf16 %v633_v13, %v632_v12  ;;  %v1230_v17 = vpack.c.bf16 %v635_v16, %v634_v14  ;;  %v636_v18 = vld [vmem:[#allocation8 + $0x20] sm:$0xff]  ;;  %v637_v19 = vld [vmem:[#allocation8 + $0x28] sm:$0xff]  ;;  %v638_v21 = vld [vmem:[#allocation8 + $0x30] sm:$0xff] }
  0xb1   : > { %1181 = vmatpush3.bf16.msra.mxu0 %v1180_v40  ;;  %1205 = vmatpush3.bf16.msra.mxu1 %v1202_v45  ;;  %v1234_v20 = vpack.c.bf16 %v637_v19, %v636_v18  ;;  %v639_v22 = vld [vmem:[#allocation8 + $0x38] sm:$0xff]  ;;  %v640_v24 = vld [vmem:[#allocation8 + $0x40] sm:$0xff]  ;;  %v641_v26 = vld [vmem:[#allocation8 + $0x48] sm:$0xff] }
  0xb2   : > { %1183 = vmatprep.subr.bf16.mxu0 %v1182_v41  ;;  %1207 = vmatprep.subr.bf16.mxu1 %v1206_v54  ;;  %v1238_v23 = vpack.c.bf16 %v639_v22, %v638_v21  ;;  %v1242_v27 = vpack.c.bf16 %v641_v26, %v640_v24  ;;  %v642_v28 = vld [vmem:[#allocation8 + $0x50] sm:$0xff]  ;;  %v643_v29 = vld [vmem:[#allocation8 + $0x58] sm:$0xff]  ;;  %v644_v31 = vld [vmem:[#allocation8 + $0x60] sm:$0xff]  ;;  %s1949_s15 = scalar_lea.hbm %s2026_s22, %s1017_s23 }
  0xb3   : > { %v1246_v30 = vpack.c.bf16 %v643_v29, %v642_v28  ;;  %v645_v32 = vld [vmem:[#allocation8 + $0x68] sm:$0xff]  ;;  %v1005_v36 = vld [vmem:[%s1995_s2] ss:$0 sm:$0xff]  ;;  %v646_v45 = vld [vmem:[#allocation8 + $0x70] sm:$0xff] }
  0xb4   : > { %v1250_v33 = vpack.c.bf16 %v645_v32, %v644_v31  ;;  %v647_v46 = vld [vmem:[#allocation8 + $0x78] sm:$0xff]  ;;  %v733_v48 = vld [vmem:[#allocation10 + $0x8] sm:$0xff]  ;;  %v734_v52 = vld [vmem:[#allocation10 + $0x10] sm:$0xff] }
  0xb5   : > { %1185 = vmatpush3.bf16.msra.mxu0 %v1184_v49  ;;  %1209 = vmatpush3.bf16.msra.mxu1 %v1206_v54  ;;  %v1254_v47 = vpack.c.bf16 %v647_v46, %v646_v45  ;;  %v735_v49 = vld [vmem:[#allocation10 + $0x18] sm:$0xff]  ;;  %v737_v53 = vld [vmem:[#allocation10 + $0x28] sm:$0xff]  ;;  %v736_v57 = vld [vmem:[#allocation10 + $0x20] sm:$0xff] }
  0xb6   : > { %1187 = vmatprep.subr.bf16.mxu0 %v1186_v50  ;;  %1211 = vmatprep.subr.bf16.mxu1 %v1210_v62  ;;  %v732_v50 = vld [vmem:[#allocation10] sm:$0xff]  ;;  %v1258_v51 = vpack.c.bf16 %v735_v49, %v733_v48  ;;  %v739_v54 = vld [vmem:[#allocation10 + $0x38] sm:$0xff]  ;;  %v742_v3 = vld [vmem:[#allocation10 + $0x50] sm:$0xff] }
  0xb7   : > { %v1260_v55 = vpack.c.bf16 %v734_v52, %v732_v50  ;;  %v1262_v56 = vpack.c.bf16 %v739_v54, %v737_v53  ;;  %v743_v60 = vld [vmem:[#allocation10 + $0x58] sm:$0xff]  ;;  %v745_v4 = vld [vmem:[#allocation10 + $0x68] sm:$0xff]  ;;  %v746_v9 = vld [vmem:[#allocation10 + $0x70] sm:$0xff] }
  0xb8   : > { %v749_v10 = vld [vmem:[#allocation10 + $0x88] sm:$0xff]  ;;  %v748_v14 = vld [vmem:[#allocation10 + $0x80] sm:$0xff]  ;;  %v754_v21 = vld [vmem:[#allocation10 + $0xb0] sm:$0xff] }
  0xb9   : > { %1189 = vmatpush3.bf16.msra.mxu0 %v1188_v58  ;;  %1213 = vmatpush3.bf16.msra.mxu1 %v1210_v62  ;;  %v738_v58 = vld [vmem:[#allocation10 + $0x30] sm:$0xff]  ;;  %v753_v16 = vld [vmem:[#allocation10 + $0xa8] sm:$0xff]  ;;  %v764_v54 = vld [vmem:[%s2001_s8] sm:$0x3] }
  0xba   : > { %1191 = vmatprep.subr.bf16.mxu0 %v1190_v59  ;;  %1215 = vmatprep.subr.bf16.mxu1 %v1214_v5  ;;  %v741_v59 = vld [vmem:[#allocation10 + $0x48] sm:$0xff]  ;;  %v1264_v61 = vpack.c.bf16 %v738_v58, %v736_v57  ;;  %v758_v28 = vld [vmem:[#allocation10 + $0xd0] sm:$0xff] }
  0xbb   : > { %v1266_v62 = vpack.c.bf16 %v743_v60, %v741_v59  ;;  %v757_v22 = vld [vmem:[#allocation10 + $0xc8] sm:$0xff] }
  0xbd   : > { %1193 = vmatpush3.bf16.msra.mxu0 %v1192_v63  ;;  %1217 = vmatpush3.bf16.msra.mxu1 %v1214_v5  ;;  %v740_v63 = vld [vmem:[#allocation10 + $0x40] sm:$0xff]  ;;  %v747_v5 = vld [vmem:[#allocation10 + $0x78] sm:$0xff] }
  0xbe   : > { %1219 = vmatprep.subr.bf16.mxu1 %v1218_v8  ;;  %1227 = vmatprep.subr.bf16.mxu0 %v1226_v15  ;;  %v1268_v6 = vpack.c.bf16 %v742_v3, %v740_v63  ;;  %v1270_v7 = vpack.c.bf16 %v747_v5, %v745_v4 }
  0xc0   : > { %520 = vmatmul.mubr.f32.vlgmr.msra.gmra.mrb[0].mxu0 %v1915_v0 }
  0xc1   : > { %524 = vmatprep.mubr.f32.mxu0 %v1918_v1  ;;  %1221 = vmatpush3.bf16.msra.mxu1 %v1218_v8  ;;  %v744_v8 = vld [vmem:[#allocation10 + $0x60] sm:$0xff] }
  0xc2   : > { %1223 = vmatprep.subr.bf16.mxu1 %v1222_v11  ;;  %1229 = vmatpush3.bf16.msra.mxu0 %v1226_v15  ;;  %v1272_v12 = vpack.c.bf16 %v746_v9, %v744_v8  ;;  %v750_v15 = vld [vmem:[#allocation10 + $0x90] sm:$0xff] }
  0xc3   : > { %1231 = vmatprep.subr.bf16.mxu0 %v1230_v17  ;;  %v1276_v18 = vpack.c.bf16 %v750_v15, %v748_v14 }
  0xc4   : > { %525 = vmatmul.mubr.f32.gmra.mrb[2].mxu0 %v1923_v2 }
  0xc5   : > { %1225 = vmatpush3.bf16.msra.mxu1 %v1222_v11  ;;  %v751_v11 = vld [vmem:[#allocation10 + $0x98] sm:$0xff] }
  0xc6   : > { %1233 = vmatpush3.bf16.msra.mxu0 %v1230_v17  ;;  %1259 = vmatprep.subr.bf16.mxu1 %v1258_v51  ;;  %v1274_v13 = vpack.c.bf16 %v751_v11, %v749_v10  ;;  %v755_v17 = vld [vmem:[#allocation10 + $0xb8] sm:$0xff]  ;;  %v766_v51 = vlaneseq }
  0xc7   : > { %1235 = vmatprep.subr.bf16.mxu0 %v1234_v20  ;;  %v1278_v19 = vpack.c.bf16 %v755_v17, %v753_v16 }
  0xc8   : > { %v767_v52 = vshrl.u32 %v766_v51, 7 }
  0xca   : > { %1237 = vmatpush3.bf16.msra.mxu0 %v1234_v20  ;;  %v752_v20 = vld [vmem:[#allocation10 + $0xa0] sm:$0xff]  ;;  %v768_v53 = vsub.s32 0, %v767_v52 }
  0xcb   : > { %1239 = vmatprep.subr.bf16.mxu0 %v1238_v23  ;;  %v1280_v24 = vpack.c.bf16 %v754_v21, %v752_v20 }
  0xce   : > { %1241 = vmatpush3.bf16.msra.mxu0 %v1238_v23  ;;  %v759_v23 = vld [vmem:[#allocation10 + $0xd8] sm:$0xff] }
  0xcf   : > { %1243 = vmatprep.subr.bf16.mxu0 %v1242_v27  ;;  %v1282_v26 = vpack.c.bf16 %v759_v23, %v757_v22 }
  0xd2   : > { %1245 = vmatpush3.bf16.msra.mxu0 %v1242_v27  ;;  %v756_v27 = vld [vmem:[#allocation10 + $0xc0] sm:$0xff] }
  0xd3   : > { %1247 = vmatprep.subr.bf16.mxu0 %v1246_v30  ;;  %v1284_v29 = vpack.c.bf16 %v758_v28, %v756_v27 }
  0xd6   : > { %1249 = vmatpush3.bf16.msra.mxu0 %v1246_v30  ;;  %v1006_v30 = vld [vmem:[%s1997_s4] ss:$0 sm:$0xff] }
  0xd7   : > { %1251 = vmatprep.subr.bf16.mxu0 %v1250_v33 }
  0xda   : > { %1253 = vmatpush3.bf16.msra.mxu0 %v1250_v33 }
  0xdb   : > { %1255 = vmatprep.subr.bf16.mxu0 %v1254_v47 }
  0xde   : > { %1257 = vmatpush3.bf16.msra.mxu0 %v1254_v47 }
 0x193   : > { %v1050_v34 = vpop.f32.mrb[0].mxu0 }
 0x194   : > { %v1051_v35 = vpop.f32.mrb[1].mxu0 }
 0x195   : > { %v1052_v37 = vadd.f32 %v1051_v35, %v1050_v34 }
 0x197   : > { %v1053_v38 = vpop.f32.mrb[2].mxu0  ;;  %v522_v39 = vadd.f32 %v1052_v37, %v1005_v36  ;;  %v761_v37 = vld [vmem:[#allocation10 + $0xe8] sm:$0xff] }
 0x198   : > { %v1054_v40 = vpop.f32.mrb[3].mxu0 }
 0x199   : > { %v1055_v41 = vadd.f32 %v1054_v40, %v1053_v38  ;;  %v530_v42 = vmax.f32 %v522_v39, 0.0  ;;  %v763_v38 = vld [vmem:[#allocation10 + $0xf8] sm:$0xff]  ;;  %v760_v40 = vld [vmem:[#allocation10 + $0xe0] sm:$0xff] }
 0x19a   : > { %v1286_v39 = vpack.c.bf16 %v763_v38, %v761_v37 }
 0x19b   : > { %v527_v43 = vadd.f32 %v1055_v41, %v1005_v36  ;;  %1124 = vmatprep.mubr.f32.mxu1 %v530_v42  ;;  %v762_v41 = vld [vmem:[#allocation10 + $0xf0] sm:$0xff] }
 0x19c   : > { %v1288_v42 = vpack.c.bf16 %v762_v41, %v760_v40 }
 0x19d   : > { %v531_v44 = vmax.f32 %v527_v43, 0.0  ;;  %v1611_v43 = vmov 0.0  }
 0x19f   : > { %1125 = vmatmul.mubr.f32.vlgmr.msra.gmra.mrb[0].mxu1 %v531_v44  ;;  %v1007_v44 = vld [vmem:[%s1999_s6] ss:$0 sm:$0xff] }
 0x1a0   : > { %1261 = vmatpush1.bf16.msra.mxu1 %v1260_v55  ;;  %840 = vmatprep.mubr.f32.mxu1 %v1611_v43  ;;  %v772_v55 = vsub.s32 1, %v767_v52 }
 0x1a1   : > { %1263 = vmatprep.subr.bf16.mxu1 %v1262_v56  ;;  %v769_v56 = vrot.slane %v764_v54, %v768_v53 }
 0x1a2   : > { %v773_v57 = vrot.slane %v764_v54, %v772_v55 }
 0x1a4   : > { %1265 = vmatpush1.bf16.msra.mxu1 %v1264_v61 }
 0x1a5   : > { %1267 = vmatprep.subr.bf16.mxu1 %v1266_v62 }
 0x1a8   : > { %1269 = vmatpush1.bf16.msra.mxu1 %v1268_v6 }
 0x1a9   : > { %1271 = vmatprep.subr.bf16.mxu1 %v1270_v7 }
 0x1ac   : > { %1273 = vmatpush1.bf16.msra.mxu1 %v1272_v12 }
 0x1ad   : > { %1275 = vmatprep.subr.bf16.mxu1 %v1274_v13 }
 0x1b0   : > { %1277 = vmatpush1.bf16.msra.mxu1 %v1276_v18 }
 0x1b1   : > { %1279 = vmatprep.subr.bf16.mxu1 %v1278_v19 }
 0x1b4   : > { %1281 = vmatpush1.bf16.msra.mxu1 %v1280_v24 }
 0x1b5   : > { %1283 = vmatprep.subr.bf16.mxu1 %v1282_v26 }
 0x1b8   : > { %1285 = vmatpush1.bf16.msra.mxu1 %v1284_v29 }
 0x1b9   : > { %1287 = vmatprep.subr.bf16.mxu1 %v1286_v39 }
 0x1bc   : > { %1289 = vmatpush1.bf16.msra.mxu1 %v1288_v42 }
 0x272   : > { %v1126_v31 = vpop.f32.mrb[0].mxu1 }
 0x273   : > { %v627_v32 = vadd.f32 %v1126_v31, %v1006_v30  ;;  %v621_v33 = vpop.f32.mrb[1].mxu1 }
 0x274   : > { %v622_v34 = vadd.f32 %v1006_v30, %v621_v33 }
 0x275   : > { %v631_v36 = vmax.f32 %v627_v32, 0.0 }
 0x276   : > { %v630_v35 = vmax.f32 %v622_v34, 0.0 }
 0x278   : > { %1159 = vmatprep.mubr.f32.mxu0 %v630_v35 }
 0x279   : > { %1160 = vmatmul.mubr.f32.vlgmr.msra.gmra.mrb[4].mxu0 %v631_v36 }
 0x34c   : > { %v1161_v45 = vpop.f32.mrb[4].mxu0 }
 0x34d   : > { %v721_v46 = vpop.f32.mrb[5].mxu0  ;;  %v727_v48 = vadd.f32 %v1161_v45, %v1007_v44 }
 0x34e   : > { %v722_v47 = vadd.f32 %v1007_v44, %v721_v46 }
 0x34f   : > { %v731_v50 = vmax.f32 %v727_v48, 0.0 }
 0x350   : > { %v730_v49 = vmax.f32 %v722_v47, 0.0 }
 0x352   : > { %841 = vmatmul.mubr.f32.vlgmr.msra.gmra.mrb[2].mxu1 %v730_v49 }
 0x353   : > { %846 = vmatprep.mubr.f32.mxu1 %v1611_v43 }
 0x356   : > { %847 = vmatmul.mubr.f32.gmra.mrb[4].mxu1 %v731_v50 }
 0x425   : > { %v842_v58 = vpop.f32.mrb[2].mxu1 }
 0x426   : > { %v843_v59 = vadd.f32 %v842_v58, %v769_v56  ;;  %v844_v60 = vpop.f32.mrb[3].mxu1 }
 0x427   : > { %v845_v61 = vadd.f32 %v844_v60, %v773_v57 }
 0x428   : > { %v853_v62 = vadd.f32 %v843_v59, %v1915_v0 }
 0x429   : > { %v854_v63 = vadd.f32 %v845_v61, %v1911_v25  ;;  %v848_v3 = vpop.f32.mrb[4].mxu1 }
 0x42a   : > { %857 = vst [vmem:[%s409_s18] sm:$0xff] %v853_v62  ;;  %v849_v4 = vadd.f32 %v848_v3, %v769_v56  ;;  %v850_v5 = vpop.f32.mrb[5].mxu1 }
 0x42b   : > { %858 = vst [vmem:[%s409_s18 + $0x8] sm:$0xff] %v854_v63  ;;  %v851_v6 = vadd.f32 %v850_v5, %v773_v57 }
 0x42c   : > { %v855_v0 = vadd.f32 %v849_v4, %v1923_v2 }
 0x42d   : > { %v856_v25 = vadd.f32 %v851_v6, %v1918_v1 }
 0x42e   : > { %859 = vst [vmem:[%s409_s18 + $0x10] sm:$0xff] %v855_v0 }
 0x42f   : > { %860 = vst [vmem:[%s409_s18 + $0x18] sm:$0xff] %v856_v25 }
 0x430   : > { %1539 = shalt.err (!%p1536_p12)
}
 0x431   : > { %s1540_s26 = scalar_lea.hbm %s1949_s15, 512  ;;  %s1544_s18 = scalar_lea.hbm %s2026_s22, 2048 }
 0x432   : > { %p1541_p9 = scmp.ne.s32.totalorder %s1949_s15, %s1540_s26  ;;  %p1545_p4 = scmp.lt.u32.totalorder %s1949_s15, %s2026_s22 }
 0x433   : > { %p1546_p8 = scmp.lt.u32.totalorder %s1544_s18, %s1540_s26  ;;  %p1548_p0 = scmp.lt.u32.totalorder %s1540_s26, %s1949_s15 }
 0x434   : > { %p1542_p13 = pnand %p1541_p9, %p1838_p3 }
 0x435   : > { %p1547_p6 = por %p1546_p8, %p1545_p4 }
 0x436   : > { %p1543_p10 = pneg %p1542_p13 }
 0x437   : > { %p1549_p5 = por %p1548_p0, %p1547_p6 }
 0x439   : > { %p1550_p7 = pnand %p1549_p5, %p1543_p10 }
 0x43b   : > { %1553 = shalt.err (!%p1550_p7)
}
 0x43c   : > { %s1613_s24 = smov 256   ;;  %s1614_s17 = smov 16  }
 0x43d   : > { %1308 = dma.vmem_to_hbm [thread:$0]  (%p1838_p3), %s1943_s16, 512, %s1949_s15, %s862_s13, %s1613_s24, %s1613_s24, %s1614_s17  }
 0x43e PF: > { %s2027_s25 = sld [smem:[#allocation16_spill]]  ;;  %s2028_s14 = sld [smem:[#allocation17_spill]] }
 0x43f   : > { %p1340_p11 = scmp.ge.s32.totalorder %s1600_s12, 2 }
 0x444   : > { %s891_s19 = sand.u32 1, %s2027_s25   ;;  %p2029_p1 = scmp.ne.s32.totalorder %s2028_s14, 0 }
 0x445   : > { %s892_s26 = scalar_lea.sflag [#allocation4], %s891_s19 }
 0x446   : > { %p1328_p2 = pnand %p1340_p11, %p2029_p1 }
 0x448   : > { %1583 = dma.done.wait (!%p1328_p2), %s892_s26, 512  }
 0x449   : > { %1585 = vsyncadd (!%p1328_p2), %s892_s26, 4294966784  ;;  %p24_p12 = scmp.ge.s32.totalorder %s1825_s9, 6   ;;  %s2030_s30 = smov %s1592_s10 }
 0x44a   : > { %s2031_s10 = smov %s1596_s11  ;;  %s2032_s11 = smov %s1834_s28 }
 0x44b   : > { %s2033_s12 = smov %s1825_s9  ;;  %26 = sbr.rel (!%p24_p12) target bundleno = 9 (0x9), region = 117 }
 0x452   :  { %897 = vsyncpa [#allocation3], 1 }
 0x453   :  { %899 = vsyncpa [#allocation3 + $0x1], 1 }
 0x454   :  { %900 = vsyncpa [#allocation6], 1 }
 0x455   :  { %901 = vsyncpa [#allocation9], 1 }
 0x456   :  { %902 = vsyncpa [#allocation4], 1 }
 0x457   :  { %904 = vsyncpa [#allocation4 + $0x1], 1 }

// kernel: tpu_custom_call.1
= control target key start
LH: loop header
LB: loop body
LE: loop exit
PB: predicated region body
PF: predicated region fallthrough
CT: control target
= control target key end

     0   :  { %s1993_s0 = inlined_call_operand.hbm [shape: f32[64,256], index: 0, kind: input, shape index: {}]   ;;  %s1994_s1 = inlined_call_operand.hbm [shape: f32[256,128], index: 1, kind: input, shape index: {}]   ;;  %s1995_s2 = inlined_call_operand.vmem [shape: f32[1,128], index: 2, kind: input, shape index: {}]   ;;  %s1996_s3 = inlined_call_operand.hbm [shape: f32[128,128], index: 3, kind: input, shape index: {}]   ;;  %s1997_s4 = inlined_call_operand.vmem [shape: f32[1,128], index: 4, kind: input, shape index: {}]   ;;  %s1998_s5 = inlined_call_operand.hbm [shape: f32[128,128], index: 5, kind: input, shape index: {}]   ;;  %s1999_s6 = inlined_call_operand.vmem [shape: f32[1,128], index: 6, kind: input, shape index: {}]   ;;  %s2000_s7 = inlined_call_operand.hbm [shape: f32[128,256], index: 7, kind: input, shape index: {}]   ;;  %s2001_s8 = inlined_call_operand.vmem [shape: f32[1,256], index: 8, kind: input, shape index: {}]   ;;  %s2002_s9 = inlined_call_operand.hbm [shape: f32[64,256], index: 9, kind: output, shape index: {}]  }
   0x1   :  { %2009 = sst [smem:[#allocation18_spill]] %s2002_s9 }
   0x2   :  { %14 = vsyncpa [#allocation3], 0 }
   0x3   :  { %16 = vsyncpa [#allocation3 + $0x1], 0 }
   0x4   :  { %17 = vsyncpa [#allocation6], 0 }
   0x5   :  { %18 = vsyncpa [#allocation9], 0 }
   0x6   :  { %19 = vsyncpa [#allocation4], 0 }
   0x7   :  { %21 = vsyncpa [#allocation4 + $0x1], 0  ;;  %s1665_s30 = smov 0   ;;  %s1667_s10 = smov 0  }
   0x8   :  { %s1669_s11 = smov 0   ;;  %s1671_s12 = smov 0  }
   0x9 LB: > { %2010 = sst [smem:[#allocation16_spill]] %s1588_s30  ;;  %s1686_s13 = sadd.s32 4294967295, %s1600_s12   ;;  %s1600_s12 = sphi %s1671_s12, %s2033_s12   ;;  %s1596_s11 = sphi %s1669_s11, %s2032_s11   ;;  %s1592_s10 = sphi %s1667_s10, %s2031_s10   ;;  %s1588_s30 = sphi %s1665_s30, %s2030_s30  }
   0xa   : > { %s987_s14 = sadd.s32 4294967294, %s1600_s12   ;;  %p47_p0 = scmp.ne.s32.totalorder %s1592_s10, %s1588_s30 }
   0xb   : > { %p2003_p1 = scmp.eq.s32.totalorder %s1686_s13, 0  ;;  %p245_p3 = scmp.eq.s32.totalorder %s987_s14, 3 }
   0xc   : > { %p988_p5 = scmp.ge.s32.totalorder %s1600_s12, 1  ;;  %p252_p7 = scmp.lt.s32.totalorder %s1600_s12, 5 }
   0xd   : > { %p1695_p4 = por %p2003_p1, %p47_p0  ;;  %p1700_p6 = por %p245_p3, %p47_p0 }
   0xe   : > { %p1705_p8 = pnand %p988_p5, %p252_p7  ;;  %s1602_s18 = smov [#allocation5]  }
   0xf   : > { %s2011_s15 = scalar_select %p1695_p4, 1, 0 }
  0x10   : > { %s2012_s16 = scalar_select %p1700_p6, 1, 0 }
  0x11   : > { %s2014_s17 = scalar_select %p1705_p8, 1, 0 }
  0x12   : > { %2013 = sst [smem:[#allocation17_spill]] %s2012_s16  ;;  %s264_s19 = sshll.u32 %s1602_s18, 4  ;;  %s1709_s19 = int_to_ptr.vmem [resolvable:$true] %s264_s19 }
  0x13   : > { %p1310_p9 = pneg %p1705_p8  ;;  %s1603_s21 = smov [#allocation8]  }
  0x14   : > { %s296_s22 = sshll.u32 %s1603_s21, 4  ;;  %s1604_s23 = smov [#allocation7]   ;;  %s1719_s22 = int_to_ptr.vmem [resolvable:$true] %s296_s22 }
  0x15   : > { %p1715_p10 = pnand %p1310_p9, %p2003_p1  ;;  %s1721_s24 = sshll.u32 %s1604_s23, 4  ;;  %s281_s24 = int_to_ptr.vmem [resolvable:$true] %s1721_s24 }
  0x16   : > { %s1384_s27 = scalar_lea.hbm %s1994_s1, 4096 }
  0x17   : > { %p1385_p11 = scmp.ne.s32.totalorder %s1994_s1, %s1384_s27  ;;  %p1731_p12 = pneg %p1715_p10 }
  0x18   : > { %p1391_p3 = scmp.lt.u32.totalorder %s1384_s27, %s1994_s1 }
  0x19   : > { %p1387_p13 = pnand %p1731_p12, %p1385_p11 }
  0x1b   : > { %p1388_p0 = pneg %p1387_p13 }
  0x1d   : > { %p1393_p5 = pnand %p1391_p3, %p1388_p0 }
  0x1f   : > { %1396 = shalt.err (!%p1393_p5)
}
  0x20   : > { %s1397_s23 = scalar_lea.vmem %s1709_s19, 4096  ;;  %p1405_p2 = scmp.lt.s32.totalorder %s1709_s19, %s1709_s19 }
  0x21   : > { %p1398_p7 = scmp.ne.s32.totalorder %s1709_s19, %s1397_s23  ;;  %p1406_p6 = scmp.lt.s32.totalorder %s1397_s23, %s1397_s23 }
  0x23   : > { %p1400_p9 = pnand %p1398_p7, %p1731_p12  ;;  %p1407_p11 = por %p1406_p6, %p1405_p2 }
  0x25   : > { %p1401_p1 = pneg %p1400_p9 }
  0x27   : > { %p1408_p13 = pnand %p1407_p11, %p1401_p1 }
  0x29   : > { %1411 = shalt.err (!%p1408_p13)
}
  0x2a   : > { %s1605_s25 = smov 128   ;;  %s1606_s26 = smov 8  }
  0x2b   : > { %1313 = dma.hbm_to_vmem [thread:$0]  (!%p1715_p10), %s1994_s1, 4096, %s1709_s19, [#allocation6], %s1605_s25, %s1605_s25, %s1606_s26  }
  0x2c   : > { %s1412_s21 = scalar_lea.hbm %s1998_s5, 2048 }
  0x2d   : > { %p1413_p1 = scmp.ne.s32.totalorder %s1998_s5, %s1412_s21  ;;  %p1419_p0 = scmp.lt.u32.totalorder %s1412_s21, %s1998_s5 }
  0x2f   : > { %p1415_p2 = pnand %p1413_p1, %p1731_p12 }
  0x31   : > { %p1416_p6 = pneg %p1415_p2 }
  0x33   : > { %p1421_p3 = pnand %p1419_p0, %p1416_p6 }
  0x35   : > { %1424 = shalt.err (!%p1421_p3)
}
  0x36   : > { %s1425_s19 = scalar_lea.vmem %s1719_s22, 2048  ;;  %p1433_p11 = scmp.lt.s32.totalorder %s1719_s22, %s1719_s22 }
  0x37   : > { %p1426_p5 = scmp.ne.s32.totalorder %s1719_s22, %s1425_s19  ;;  %p1434_p13 = scmp.lt.s32.totalorder %s1425_s19, %s1425_s19 }
  0x39   : > { %p1428_p7 = pnand %p1426_p5, %p1731_p12  ;;  %p1435_p1 = por %p1434_p13, %p1433_p11 }
  0x3b   : > { %p1429_p9 = pneg %p1428_p7 }
  0x3d   : > { %p1436_p2 = pnand %p1435_p1, %p1429_p9 }
  0x3f   : > { %1439 = shalt.err (!%p1436_p2)
}
  0x40   : > { %1319 = dma.hbm_to_vmem [thread:$0]  (!%p1715_p10), %s1998_s5, 2048, %s1719_s22, [#allocation9], %s1605_s25, %s1605_s25, %s1606_s26  }
  0x41   : > { %s1440_s28 = scalar_lea.hbm %s1996_s3, 2048 }
  0x42   : > { %p1441_p6 = scmp.ne.s32.totalorder %s1996_s3, %s1440_s28  ;;  %p1447_p5 = scmp.lt.u32.totalorder %s1440_s28, %s1996_s3 }
  0x44   : > { %p1443_p0 = pnand %p1441_p6, %p1731_p12 }
  0x46   : > { %p1444_p3 = pneg %p1443_p0 }
  0x48   : > { %p1449_p7 = pnand %p1447_p5, %p1444_p3 }
  0x4a   : > { %1452 = shalt.err (!%p1449_p7)
}
  0x4b   : > { %s1453_s19 = scalar_lea.vmem %s281_s24, 2048  ;;  %p1461_p1 = scmp.lt.s32.totalorder %s281_s24, %s281_s24 }
  0x4c   : > { %p1454_p9 = scmp.ne.s32.totalorder %s281_s24, %s1453_s19  ;;  %p1462_p2 = scmp.lt.s32.totalorder %s1453_s19, %s1453_s19 }
  0x4e   : > { %p1456_p11 = pnand %p1454_p9, %p1731_p12  ;;  %p1463_p4 = por %p1462_p2, %p1461_p1 }
  0x50   : > { %p1457_p13 = pneg %p1456_p11 }
  0x52   : > { %p1464_p8 = pnand %p1463_p4, %p1457_p13 }
  0x54   : > { %1467 = shalt.err (!%p1464_p8)
}
  0x55   : > { %1316 = dma.hbm_to_vmem [thread:$0]  (!%p1715_p10), %s1996_s3, 2048, %s281_s24, [#allocation6], %s1605_s25, %s1605_s25, %s1606_s26  }
  0x56   : > { %s1607_s30 = smov [#allocation10]   ;;  %s1468_s29 = scalar_lea.hbm %s2000_s7, 4096 }
  0x57   : > { %s312_s16 = sshll.u32 %s1607_s30, 4  ;;  %p1469_p4 = scmp.ne.s32.totalorder %s2000_s7, %s1468_s29  ;;  %s313_s16 = int_to_ptr.vmem [resolvable:$true] %s312_s16 }
  0x58   : > { %p1475_p0 = scmp.lt.u32.totalorder %s1468_s29, %s2000_s7 }
  0x59   : > { %p1471_p8 = pnand %p1469_p4, %p1731_p12 }
  0x5b   : > { %p1472_p6 = pneg %p1471_p8 }
  0x5d   : > { %p1477_p3 = pnand %p1475_p0, %p1472_p6 }
  0x5f   : > { %1480 = shalt.err (!%p1477_p3)
}
  0x60   : > { %s1481_s24 = scalar_lea.vmem %s313_s16, 4096  ;;  %p1489_p11 = scmp.lt.s32.totalorder %s313_s16, %s313_s16 }
  0x61   : > { %p1482_p5 = scmp.ne.s32.totalorder %s313_s16, %s1481_s24  ;;  %p1490_p13 = scmp.lt.s32.totalorder %s1481_s24, %s1481_s24 }
  0x63   : > { %p1484_p7 = pnand %p1482_p5, %p1731_p12  ;;  %p1491_p1 = por %p1490_p13, %p1489_p11 }
  0x65   : > { %p1485_p9 = pneg %p1484_p7 }
  0x67   : > { %p1492_p2 = pnand %p1491_p1, %p1485_p9 }
  0x69   : > { %1495 = shalt.err (!%p1492_p2)
}
  0x6a   : > { %s1608_s25 = smov 256   ;;  %s1609_s14 = smov 16  }
  0x6b   : > { %1322 = dma.hbm_to_vmem [thread:$0]  (!%p1715_p10), %s2000_s7, 4096, %s313_s16, [#allocation9], %s1608_s25, %s1608_s25, %s1609_s14  }
  0x6c   : > { %s1825_s9 = sadd.s32 1, %s1600_s12   ;;  %s34_s27 = sadd.s32 1, %s1596_s11 }
  0x6d   : > { %s31_s30 = ssub.s32 %s1600_s12, %s1825_s9  ;;  %p41_p4 = scmp.ne.s32.totalorder %s1596_s11, %s1592_s10 }
  0x6e   : > { %p32_p12 = scmp.eq.s32.totalorder %s31_s30, 0  ;;  %p42_p8 = scmp.eq.s32.totalorder %s1600_s12, 0 }
  0x6f   : > { %p2017_p0 = scmp.eq.s32.totalorder %s1686_s13, 3  ;;  %p1335_p5 = scmp.lt.s32.totalorder %s1600_s12, 4 }
  0x70   : > { %s1834_s28 = scalar_select %p32_p12, %s1596_s11, %s34_s27  }
  0x71   : > { %p43_p6 = por %p42_p8, %p41_p4  ;;  %p1838_p3 = por %p2017_p0, %p41_p4 }
  0x72   : > { %s329_s29 = sand.u32 1, %s1596_s11   ;;  %s1015_s16 = sshll.u32 %s1600_s12, 9 }
  0x73   : > { %s994_s18 = sshll.u32 %s329_s29, 5  ;;  %s1848_s19 = scalar_lea.hbm %s1993_s0, %s1015_s16 }
  0x74   : > { %s333_s24 = scalar_lea.vmem [#allocation2], %s994_s18  ;;  %p1852_p10 = pnand %p1335_p5, %p43_p6 }
  0x75   : > { %s341_s26 = sshll.u32 %s333_s24, 4  ;;  %s1856_s30 = scalar_lea.sflag [#allocation3], %s329_s29  ;;  %s1850_s26 = int_to_ptr.vmem [resolvable:$true] %s341_s26 }
  0x76   : > { %s1496_s27 = scalar_lea.hbm %s1848_s19, 512  ;;  %p1498_p9 = pneg %p1852_p10 }
  0x77   : > { %p1497_p7 = scmp.ne.s32.totalorder %s1848_s19, %s1496_s27  ;;  %s1501_s21 = scalar_lea.hbm %s1993_s0, 2048 }
  0x78   : > { %p1502_p1 = scmp.lt.u32.totalorder %s1848_s19, %s1993_s0  ;;  %p1503_p2 = scmp.lt.u32.totalorder %s1501_s21, %s1496_s27 }
  0x79   : > { %p1499_p11 = pnand %p1498_p9, %p1497_p7  ;;  %p1505_p4 = scmp.lt.u32.totalorder %s1496_s27, %s1848_s19 }
  0x7a   : > { %p1504_p12 = por %p1503_p2, %p1502_p1 }
  0x7b   : > { %p1500_p13 = pneg %p1499_p11 }
  0x7c   : > { %p1506_p8 = por %p1505_p4, %p1504_p12 }
  0x7e   : > { %p1507_p6 = pnand %p1506_p8, %p1500_p13 }
  0x80   : > { %1510 = shalt.err (!%p1507_p6)
}
  0x81   : > { %s1511_s29 = scalar_lea.vmem %s1850_s26, 512  ;;  %s1610_s18 = smov [#allocation2]  }
  0x82   : > { %p1512_p0 = scmp.ne.s32.totalorder %s1850_s26, %s1511_s29  ;;  %s1516_s16 = sshll.u32 %s1610_s18, 4  ;;  %s1517_s16 = int_to_ptr.vmem [resolvable:$false] %s1516_s16 }
  0x83   : > { %s1518_s23 = scalar_lea.vmem %s1517_s16, 1024  ;;  %p1519_p11 = scmp.lt.s32.totalorder %s1850_s26, %s1517_s16 }
  0x84   : > { %p1514_p5 = pnand %p1512_p0, %p1498_p9  ;;  %p1520_p1 = scmp.lt.s32.totalorder %s1518_s23, %s1511_s29 }
  0x86   : > { %p1515_p7 = pneg %p1514_p5  ;;  %p1521_p2 = por %p1520_p1, %p1519_p11 }
  0x88   : > { %p1522_p12 = pnand %p1521_p2, %p1515_p7 }
  0x8a   : > { %1525 = shalt.err (!%p1522_p12)
}
  0x8b   : > { %1326 = dma.hbm_to_vmem [thread:$0]  (!%p1852_p10), %s1848_s19, 512, %s1850_s26, %s1856_s30, %s1608_s25, %s1608_s25, %s1609_s14  }
  0x8c   : > { %p2020_p9 = scmp.ne.s32.totalorder %s2014_s17, 0 }
  0x8d   : > { %s1890_s27 = sand.u32 (!%p2020_p9), 1, %s1592_s10   ;;  %p2021_p13 = scmp.ne.s32.totalorder (!%p2020_p9), %s2011_s15, 0 }
  0x8e   : > { %353 = sbr.rel (%p2020_p9) target bundleno = 1086 (0x43e), region = 56  ;;  %s999_s21 = sshll.u32 (!%p2020_p9), %s1890_s27, 5 }
  0x8f   : > { %s356_s24 = scalar_lea.sflag (!%p2020_p9), [#allocation3], %s1890_s27  ;;  %s1896_s22 = scalar_lea.vmem (!%p2020_p9), [#allocation2], %s999_s21 }
  0x95   : > { %1571 = dma.done.wait (%p2021_p13), %s356_s24, 512  }
  0x96   : > { %1573 = vsyncadd (%p2021_p13), %s356_s24, 4294966784  ;;  %p2022_p10 = scmp.eq.s32.totalorder %s1686_s13, 0 }
  0x98   : > { %1575 = dma.done.wait (%p2022_p10), [#allocation6], 6144   ;;  %p2023_p4 = pmov %p2022_p10 }
  0x9a   : > { %1577 = vsyncadd (%p2023_p4), [#allocation6], 4294961152  ;;  %p2024_p8 = pmov %p2023_p4 }
  0x9b   : > { %p2025_p6 = pmov %p2023_p4 }
  0x9c   : > { %1579 = dma.done.wait (%p2024_p8), [#allocation9], 6144  }
  0x9d   : > { %1581 = vsyncadd (%p2025_p6), [#allocation9], 4294961152  ;;  %v432_v0 = vld [vmem:[#allocation5 + $0x80] sm:$0xff]  ;;  %v433_v1 = vld [vmem:[#allocation5 + $0x88] sm:$0xff]  ;;  %s409_s18 = scalar_lea.vmem [#allocation11], %s999_s21  ;;  %s1017_s23 = sshll.u32 %s1686_s13, 9 }
  0x9e   : > { %v416_v2 = vld [vmem:[#allocation5] sm:$0xff]  ;;  %v1162_v3 = vpack.c.bf16 %v433_v1, %v432_v0  ;;  %v417_v4 = vld [vmem:[#allocation5 + $0x8] sm:$0xff]  ;;  %v434_v5 = vld [vmem:[#allocation5 + $0x90] sm:$0xff]  ;;  %s876_s16 = sshll.u32 %s409_s18, 4  ;;  %s862_s13 = scalar_lea.sflag [#allocation4], %s1890_s27  ;;  %s1943_s16 = int_to_ptr.vmem [resolvable:$true] %s876_s16 }
  0x9f   : > { %v435_v6 = vld [vmem:[#allocation5 + $0x98] sm:$0xff]  ;;  %v1164_v7 = vpack.c.bf16 %v417_v4, %v416_v2  ;;  %v418_v9 = vld [vmem:[#allocation5 + $0x10] sm:$0xff]  ;;  %v436_v11 = vld [vmem:[#allocation5 + $0xa0] sm:$0xff]  ;;  %s1526_s17 = scalar_lea.vmem %s1943_s16, 512  ;;  %s1612_s25 = smov [#allocation11]  }
  0xa0   : > { %v1166_v8 = vpack.c.bf16 %v435_v6, %v434_v5  ;;  %v419_v10 = vld [vmem:[#allocation5 + $0x18] sm:$0xff]  ;;  %1163 = vmatprep.subr.bf16.mxu0 %v1162_v3  ;;  %v437_v12 = vld [vmem:[#allocation5 + $0xa8] sm:$0xff]  ;;  %v420_v15 = vld [vmem:[#allocation5 + $0x20] sm:$0xff]  ;;  %p1527_p0 = scmp.ne.s32.totalorder %s1943_s16, %s1526_s17  ;;  %s1530_s14 = sshll.u32 %s1612_s25, 4  ;;  %s1531_s14 = int_to_ptr.vmem [resolvable:$false] %s1530_s14 }
  0xa1   : > { %1165 = vmatpush3.bf16.msra.mxu0 %v1164_v7  ;;  %v1168_v13 = vpack.c.bf16 %v419_v10, %v418_v9  ;;  %v1170_v14 = vpack.c.bf16 %v437_v12, %v436_v11  ;;  %v421_v16 = vld [vmem:[#allocation5 + $0x28] sm:$0xff]  ;;  %v438_v17 = vld [vmem:[#allocation5 + $0xb0] sm:$0xff]  ;;  %v439_v18 = vld [vmem:[#allocation5 + $0xb8] sm:$0xff]  ;;  %s1532_s19 = scalar_lea.vmem %s1531_s14, 1024  ;;  %p1533_p11 = scmp.lt.s32.totalorder %s1943_s16, %s1531_s14 }
  0xa2   : > { %1167 = vmatprep.subr.bf16.mxu0 %v1166_v8  ;;  %v1172_v19 = vpack.c.bf16 %v421_v16, %v420_v15  ;;  %v1174_v20 = vpack.c.bf16 %v439_v18, %v438_v17  ;;  %v422_v21 = vld [vmem:[#allocation5 + $0x30] sm:$0xff]  ;;  %v423_v22 = vld [vmem:[#allocation5 + $0x38] sm:$0xff]  ;;  %v440_v23 = vld [vmem:[#allocation5 + $0xc0] sm:$0xff]  ;;  %p1528_p5 = pnand %p1527_p0, %p1838_p3  ;;  %p1534_p1 = scmp.lt.s32.totalorder %s1532_s19, %s1526_s17 }
  0xa3   : > { %v441_v24 = vld [vmem:[#allocation5 + $0xc8] sm:$0xff]  ;;  %v424_v26 = vld [vmem:[#allocation5 + $0x40] sm:$0xff]  ;;  %v1176_v27 = vpack.c.bf16 %v423_v22, %v422_v21  ;;  %v534_v30 = vld [vmem:[#allocation7 + $0x10] sm:$0xff] }
  0xa4   : > { %v1911_v25 = vld [vmem:[%s1896_s22 + $0x8] sm:$0xff]  ;;  %v532_v28 = vld [vmem:[#allocation7] sm:$0xff]  ;;  %v1178_v31 = vpack.c.bf16 %v441_v24, %v440_v23  ;;  %v442_v33 = vld [vmem:[#allocation5 + $0xd0] sm:$0xff]  ;;  %p1529_p7 = pneg %p1528_p5  ;;  %p1535_p2 = por %p1534_p1, %p1533_p11 }
  0xa5   : > { %1169 = vmatpush3.bf16.msra.mxu0 %v1168_v13  ;;  %519 = vmatprep.mubr.f32.mxu0 %v1911_v25  ;;  %v533_v29 = vld [vmem:[#allocation7 + $0x8] sm:$0xff]  ;;  %v535_v35 = vld [vmem:[#allocation7 + $0x18] sm:$0xff]  ;;  %v536_v38 = vld [vmem:[#allocation7 + $0x20] sm:$0xff] }
  0xa6   : > { %1171 = vmatprep.subr.bf16.mxu0 %v1170_v14  ;;  %v425_v32 = vld [vmem:[#allocation5 + $0x48] sm:$0xff]  ;;  %v1194_v34 = vpack.c.bf16 %v533_v29, %v532_v28  ;;  %v443_v36 = vld [vmem:[#allocation5 + $0xd8] sm:$0xff]  ;;  %v1198_v37 = vpack.c.bf16 %v535_v35, %v534_v30  ;;  %v426_v42 = vld [vmem:[#allocation5 + $0x50] sm:$0xff]  ;;  %p1536_p12 = pnand %p1535_p2, %p1529_p7 }
  0xa7   : > { %v537_v39 = vld [vmem:[#allocation7 + $0x28] sm:$0xff]  ;;  %v1180_v40 = vpack.c.bf16 %v425_v32, %v424_v26  ;;  %v1182_v41 = vpack.c.bf16 %v443_v36, %v442_v33  ;;  %v427_v43 = vld [vmem:[#allocation5 + $0x58] sm:$0xff]  ;;  %v444_v44 = vld [vmem:[#allocation5 + $0xe0] sm:$0xff] }
  0xa8   : > { %1195 = vmatprep.subr.bf16.mxu1 %v1194_v34  ;;  %v1202_v45 = vpack.c.bf16 %v537_v39, %v536_v38  ;;  %v445_v46 = vld [vmem:[#allocation5 + $0xe8] sm:$0xff]  ;;  %v538_v47 = vld [vmem:[#allocation7 + $0x30] sm:$0xff]  ;;  %v539_v48 = vld [vmem:[#allocation7 + $0x38] sm:$0xff]  ;;  %v1184_v49 = vpack.c.bf16 %v427_v43, %v426_v42 }
  0xa9   : > { %1173 = vmatpush3.bf16.msra.mxu0 %v1172_v19  ;;  %1197 = vmatpush3.bf16.msra.mxu1 %v1194_v34  ;;  %v1186_v50 = vpack.c.bf16 %v445_v46, %v444_v44  ;;  %v428_v51 = vld [vmem:[#allocation5 + $0x60] sm:$0xff]  ;;  %v429_v52 = vld [vmem:[#allocation5 + $0x68] sm:$0xff]  ;;  %v446_v53 = vld [vmem:[#allocation5 + $0xf0] sm:$0xff]  ;;  %v1206_v54 = vpack.c.bf16 %v539_v48, %v538_v47 }
  0xaa   : > { %1175 = vmatprep.subr.bf16.mxu0 %v1174_v20  ;;  %1199 = vmatprep.subr.bf16.mxu1 %v1198_v37  ;;  %v447_v55 = vld [vmem:[#allocation5 + $0xf8] sm:$0xff]  ;;  %v540_v56 = vld [vmem:[#allocation7 + $0x40] sm:$0xff]  ;;  %v541_v57 = vld [vmem:[#allocation7 + $0x48] sm:$0xff]  ;;  %v1188_v58 = vpack.c.bf16 %v429_v52, %v428_v51 }
  0xab   : > { %v1190_v59 = vpack.c.bf16 %v447_v55, %v446_v53  ;;  %v430_v60 = vld [vmem:[#allocation5 + $0x70] sm:$0xff]  ;;  %v431_v61 = vld [vmem:[#allocation5 + $0x78] sm:$0xff]  ;;  %v1210_v62 = vpack.c.bf16 %v541_v57, %v540_v56  ;;  %v1915_v0 = vld [vmem:[%s1896_s22] sm:$0xff] }
  0xac   : > { %v1192_v63 = vpack.c.bf16 %v431_v61, %v430_v60  ;;  %v1918_v1 = vld [vmem:[%s1896_s22 + $0x18] sm:$0xff]  ;;  %v1923_v2 = vld [vmem:[%s1896_s22 + $0x10] sm:$0xff]  ;;  %v544_v6 = vld [vmem:[#allocation7 + $0x60] sm:$0xff]  ;;  %s2026_s22 = sld [smem:[#allocation18_spill]] }
  0xad   : > { %1177 = vmatpush3.bf16.msra.mxu0 %v1176_v27  ;;  %1201 = vmatpush3.bf16.msra.mxu1 %v1198_v37  ;;  %v542_v3 = vld [vmem:[#allocation7 + $0x50] sm:$0xff]  ;;  %v543_v4 = vld [vmem:[#allocation7 + $0x58] sm:$0xff]  ;;  %v545_v7 = vld [vmem:[#allocation7 + $0x68] sm:$0xff] }
  0xae   : > { %1179 = vmatprep.subr.bf16.mxu0 %v1178_v31  ;;  %1203 = vmatprep.subr.bf16.mxu1 %v1202_v45  ;;  %v1214_v5 = vpack.c.bf16 %v543_v4, %v542_v3  ;;  %v1218_v8 = vpack.c.bf16 %v545_v7, %v544_v6  ;;  %v546_v9 = vld [vmem:[#allocation7 + $0x70] sm:$0xff]  ;;  %v547_v10 = vld [vmem:[#allocation7 + $0x78] sm:$0xff]  ;;  %v632_v12 = vld [vmem:[#allocation8] sm:$0xff] }
  0xaf   : > { %v1222_v11 = vpack.c.bf16 %v547_v10, %v546_v9  ;;  %v633_v13 = vld [vmem:[#allocation8 + $0x8] sm:$0xff]  ;;  %v634_v14 = vld [vmem:[#allocation8 + $0x10] sm:$0xff]  ;;  %v635_v16 = vld [vmem:[#allocation8 + $0x18] sm:$0xff] }
  0xb0   : > { %v1226_v15 = vpack.c.bf16 %v633_v13, %v632_v12  ;;  %v1230_v17 = vpack.c.bf16 %v635_v16, %v634_v14  ;;  %v636_v18 = vld [vmem:[#allocation8 + $0x20] sm:$0xff]  ;;  %v637_v19 = vld [vmem:[#allocation8 + $0x28] sm:$0xff]  ;;  %v638_v21 = vld [vmem:[#allocation8 + $0x30] sm:$0xff] }
  0xb1   : > { %1181 = vmatpush3.bf16.msra.mxu0 %v1180_v40  ;;  %1205 = vmatpush3.bf16.msra.mxu1 %v1202_v45  ;;  %v1234_v20 = vpack.c.bf16 %v637_v19, %v636_v18  ;;  %v639_v22 = vld [vmem:[#allocation8 + $0x38] sm:$0xff]  ;;  %v640_v24 = vld [vmem:[#allocation8 + $0x40] sm:$0xff]  ;;  %v641_v26 = vld [vmem:[#allocation8 + $0x48] sm:$0xff] }
  0xb2   : > { %1183 = vmatprep.subr.bf16.mxu0 %v1182_v41  ;;  %1207 = vmatprep.subr.bf16.mxu1 %v1206_v54  ;;  %v1238_v23 = vpack.c.bf16 %v639_v22, %v638_v21  ;;  %v1242_v27 = vpack.c.bf16 %v641_v26, %v640_v24  ;;  %v642_v28 = vld [vmem:[#allocation8 + $0x50] sm:$0xff]  ;;  %v643_v29 = vld [vmem:[#allocation8 + $0x58] sm:$0xff]  ;;  %v644_v31 = vld [vmem:[#allocation8 + $0x60] sm:$0xff]  ;;  %s1949_s15 = scalar_lea.hbm %s2026_s22, %s1017_s23 }
  0xb3   : > { %v1246_v30 = vpack.c.bf16 %v643_v29, %v642_v28  ;;  %v645_v32 = vld [vmem:[#allocation8 + $0x68] sm:$0xff]  ;;  %v1005_v36 = vld [vmem:[%s1995_s2] ss:$0 sm:$0xff]  ;;  %v646_v45 = vld [vmem:[#allocation8 + $0x70] sm:$0xff] }
  0xb4   : > { %v1250_v33 = vpack.c.bf16 %v645_v32, %v644_v31  ;;  %v647_v46 = vld [vmem:[#allocation8 + $0x78] sm:$0xff]  ;;  %v733_v48 = vld [vmem:[#allocation10 + $0x8] sm:$0xff]  ;;  %v734_v52 = vld [vmem:[#allocation10 + $0x10] sm:$0xff] }
  0xb5   : > { %1185 = vmatpush3.bf16.msra.mxu0 %v1184_v49  ;;  %1209 = vmatpush3.bf16.msra.mxu1 %v1206_v54  ;;  %v1254_v47 = vpack.c.bf16 %v647_v46, %v646_v45  ;;  %v735_v49 = vld [vmem:[#allocation10 + $0x18] sm:$0xff]  ;;  %v737_v53 = vld [vmem:[#allocation10 + $0x28] sm:$0xff]  ;;  %v736_v57 = vld [vmem:[#allocation10 + $0x20] sm:$0xff] }
  0xb6   : > { %1187 = vmatprep.subr.bf16.mxu0 %v1186_v50  ;;  %1211 = vmatprep.subr.bf16.mxu1 %v1210_v62  ;;  %v732_v50 = vld [vmem:[#allocation10] sm:$0xff]  ;;  %v1258_v51 = vpack.c.bf16 %v735_v49, %v733_v48  ;;  %v739_v54 = vld [vmem:[#allocation10 + $0x38] sm:$0xff]  ;;  %v742_v3 = vld [vmem:[#allocation10 + $0x50] sm:$0xff] }
  0xb7   : > { %v1260_v55 = vpack.c.bf16 %v734_v52, %v732_v50  ;;  %v1262_v56 = vpack.c.bf16 %v739_v54, %v737_v53  ;;  %v743_v60 = vld [vmem:[#allocation10 + $0x58] sm:$0xff]  ;;  %v745_v4 = vld [vmem:[#allocation10 + $0x68] sm:$0xff]  ;;  %v746_v9 = vld [vmem:[#allocation10 + $0x70] sm:$0xff] }
  0xb8   : > { %v749_v10 = vld [vmem:[#allocation10 + $0x88] sm:$0xff]  ;;  %v748_v14 = vld [vmem:[#allocation10 + $0x80] sm:$0xff]  ;;  %v754_v21 = vld [vmem:[#allocation10 + $0xb0] sm:$0xff] }
  0xb9   : > { %1189 = vmatpush3.bf16.msra.mxu0 %v1188_v58  ;;  %1213 = vmatpush3.bf16.msra.mxu1 %v1210_v62  ;;  %v738_v58 = vld [vmem:[#allocation10 + $0x30] sm:$0xff]  ;;  %v753_v16 = vld [vmem:[#allocation10 + $0xa8] sm:$0xff]  ;;  %v764_v54 = vld [vmem:[%s2001_s8] sm:$0x3] }
  0xba   : > { %1191 = vmatprep.subr.bf16.mxu0 %v1190_v59  ;;  %1215 = vmatprep.subr.bf16.mxu1 %v1214_v5  ;;  %v741_v59 = vld [vmem:[#allocation10 + $0x48] sm:$0xff]  ;;  %v1264_v61 = vpack.c.bf16 %v738_v58, %v736_v57  ;;  %v758_v28 = vld [vmem:[#allocation10 + $0xd0] sm:$0xff] }
  0xbb   : > { %v1266_v62 = vpack.c.bf16 %v743_v60, %v741_v59  ;;  %v757_v22 = vld [vmem:[#allocation10 + $0xc8] sm:$0xff] }
  0xbd   : > { %1193 = vmatpush3.bf16.msra.mxu0 %v1192_v63  ;;  %1217 = vmatpush3.bf16.msra.mxu1 %v1214_v5  ;;  %v740_v63 = vld [vmem:[#allocation10 + $0x40] sm:$0xff]  ;;  %v747_v5 = vld [vmem:[#allocation10 + $0x78] sm:$0xff] }
  0xbe   : > { %1219 = vmatprep.subr.bf16.mxu1 %v1218_v8  ;;  %1227 = vmatprep.subr.bf16.mxu0 %v1226_v15  ;;  %v1268_v6 = vpack.c.bf16 %v742_v3, %v740_v63  ;;  %v1270_v7 = vpack.c.bf16 %v747_v5, %v745_v4 }
  0xc0   : > { %520 = vmatmul.mubr.f32.vlgmr.msra.gmra.mrb[0].mxu0 %v1915_v0 }
  0xc1   : > { %524 = vmatprep.mubr.f32.mxu0 %v1918_v1  ;;  %1221 = vmatpush3.bf16.msra.mxu1 %v1218_v8  ;;  %v744_v8 = vld [vmem:[#allocation10 + $0x60] sm:$0xff] }
  0xc2   : > { %1223 = vmatprep.subr.bf16.mxu1 %v1222_v11  ;;  %1229 = vmatpush3.bf16.msra.mxu0 %v1226_v15  ;;  %v1272_v12 = vpack.c.bf16 %v746_v9, %v744_v8  ;;  %v750_v15 = vld [vmem:[#allocation10 + $0x90] sm:$0xff] }
  0xc3   : > { %1231 = vmatprep.subr.bf16.mxu0 %v1230_v17  ;;  %v1276_v18 = vpack.c.bf16 %v750_v15, %v748_v14 }
  0xc4   : > { %525 = vmatmul.mubr.f32.gmra.mrb[2].mxu0 %v1923_v2 }
  0xc5   : > { %1225 = vmatpush3.bf16.msra.mxu1 %v1222_v11  ;;  %v751_v11 = vld [vmem:[#allocation10 + $0x98] sm:$0xff] }
  0xc6   : > { %1233 = vmatpush3.bf16.msra.mxu0 %v1230_v17  ;;  %1259 = vmatprep.subr.bf16.mxu1 %v1258_v51  ;;  %v1274_v13 = vpack.c.bf16 %v751_v11, %v749_v10  ;;  %v755_v17 = vld [vmem:[#allocation10 + $0xb8] sm:$0xff]  ;;  %v766_v51 = vlaneseq }
  0xc7   : > { %1235 = vmatprep.subr.bf16.mxu0 %v1234_v20  ;;  %v1278_v19 = vpack.c.bf16 %v755_v17, %v753_v16 }
  0xc8   : > { %v767_v52 = vshrl.u32 %v766_v51, 7 }
  0xca   : > { %1237 = vmatpush3.bf16.msra.mxu0 %v1234_v20  ;;  %v752_v20 = vld [vmem:[#allocation10 + $0xa0] sm:$0xff]  ;;  %v768_v53 = vsub.s32 0, %v767_v52 }
  0xcb   : > { %1239 = vmatprep.subr.bf16.mxu0 %v1238_v23  ;;  %v1280_v24 = vpack.c.bf16 %v754_v21, %v752_v20 }
  0xce   : > { %1241 = vmatpush3.bf16.msra.mxu0 %v1238_v23  ;;  %v759_v23 = vld [vmem:[#allocation10 + $0xd8] sm:$0xff] }
  0xcf   : > { %1243 = vmatprep.subr.bf16.mxu0 %v1242_v27  ;;  %v1282_v26 = vpack.c.bf16 %v759_v23, %v757_v22 }
  0xd2   : > { %1245 = vmatpush3.bf16.msra.mxu0 %v1242_v27  ;;  %v756_v27 = vld [vmem:[#allocation10 + $0xc0] sm:$0xff] }
  0xd3   : > { %1247 = vmatprep.subr.bf16.mxu0 %v1246_v30  ;;  %v1284_v29 = vpack.c.bf16 %v758_v28, %v756_v27 }
  0xd6   : > { %1249 = vmatpush3.bf16.msra.mxu0 %v1246_v30  ;;  %v1006_v30 = vld [vmem:[%s1997_s4] ss:$0 sm:$0xff] }
  0xd7   : > { %1251 = vmatprep.subr.bf16.mxu0 %v1250_v33 }
  0xda   : > { %1253 = vmatpush3.bf16.msra.mxu0 %v1250_v33 }
  0xdb   : > { %1255 = vmatprep.subr.bf16.mxu0 %v1254_v47 }
  0xde   : > { %1257 = vmatpush3.bf16.msra.mxu0 %v1254_v47 }
 0x193   : > { %v1050_v34 = vpop.f32.mrb[0].mxu0 }
 0x194   : > { %v1051_v35 = vpop.f32.mrb[1].mxu0 }
 0x195   : > { %v1052_v37 = vadd.f32 %v1051_v35, %v1050_v34 }
 0x197   : > { %v1053_v38 = vpop.f32.mrb[2].mxu0  ;;  %v522_v39 = vadd.f32 %v1052_v37, %v1005_v36  ;;  %v761_v37 = vld [vmem:[#allocation10 + $0xe8] sm:$0xff] }
 0x198   : > { %v1054_v40 = vpop.f32.mrb[3].mxu0 }
 0x199   : > { %v1055_v41 = vadd.f32 %v1054_v40, %v1053_v38  ;;  %v530_v42 = vmax.f32 %v522_v39, 0.0  ;;  %v763_v38 = vld [vmem:[#allocation10 + $0xf8] sm:$0xff]  ;;  %v760_v40 = vld [vmem:[#allocation10 + $0xe0] sm:$0xff] }
 0x19a   : > { %v1286_v39 = vpack.c.bf16 %v763_v38, %v761_v37 }
 0x19b   : > { %v527_v43 = vadd.f32 %v1055_v41, %v1005_v36  ;;  %1124 = vmatprep.mubr.f32.mxu1 %v530_v42  ;;  %v762_v41 = vld [vmem:[#allocation10 + $0xf0] sm:$0xff] }
 0x19c   : > { %v1288_v42 = vpack.c.bf16 %v762_v41, %v760_v40 }
 0x19d   : > { %v531_v44 = vmax.f32 %v527_v43, 0.0  ;;  %v1611_v43 = vmov 0.0  }
 0x19f   : > { %1125 = vmatmul.mubr.f32.vlgmr.msra.gmra.mrb[0].mxu1 %v531_v44  ;;  %v1007_v44 = vld [vmem:[%s1999_s6] ss:$0 sm:$0xff] }
 0x1a0   : > { %1261 = vmatpush1.bf16.msra.mxu1 %v1260_v55  ;;  %840 = vmatprep.mubr.f32.mxu1 %v1611_v43  ;;  %v772_v55 = vsub.s32 1, %v767_v52 }
 0x1a1   : > { %1263 = vmatprep.subr.bf16.mxu1 %v1262_v56  ;;  %v769_v56 = vrot.slane %v764_v54, %v768_v53 }
 0x1a2   : > { %v773_v57 = vrot.slane %v764_v54, %v772_v55 }
 0x1a4   : > { %1265 = vmatpush1.bf16.msra.mxu1 %v1264_v61 }
 0x1a5   : > { %1267 = vmatprep.subr.bf16.mxu1 %v1266_v62 }
 0x1a8   : > { %1269 = vmatpush1.bf16.msra.mxu1 %v1268_v6 }
 0x1a9   : > { %1271 = vmatprep.subr.bf16.mxu1 %v1270_v7 }
 0x1ac   : > { %1273 = vmatpush1.bf16.msra.mxu1 %v1272_v12 }
 0x1ad   : > { %1275 = vmatprep.subr.bf16.mxu1 %v1274_v13 }
 0x1b0   : > { %1277 = vmatpush1.bf16.msra.mxu1 %v1276_v18 }
 0x1b1   : > { %1279 = vmatprep.subr.bf16.mxu1 %v1278_v19 }
 0x1b4   : > { %1281 = vmatpush1.bf16.msra.mxu1 %v1280_v24 }
 0x1b5   : > { %1283 = vmatprep.subr.bf16.mxu1 %v1282_v26 }
 0x1b8   : > { %1285 = vmatpush1.bf16.msra.mxu1 %v1284_v29 }
 0x1b9   : > { %1287 = vmatprep.subr.bf16.mxu1 %v1286_v39 }
 0x1bc   : > { %1289 = vmatpush1.bf16.msra.mxu1 %v1288_v42 }
 0x272   : > { %v1126_v31 = vpop.f32.mrb[0].mxu1 }
 0x273   : > { %v627_v32 = vadd.f32 %v1126_v31, %v1006_v30  ;;  %v621_v33 = vpop.f32.mrb[1].mxu1 }
 0x274   : > { %v622_v34 = vadd.f32 %v1006_v30, %v621_v33 }
 0x275   : > { %v631_v36 = vmax.f32 %v627_v32, 0.0 }
 0x276   : > { %v630_v35 = vmax.f32 %v622_v34, 0.0 }
 0x278   : > { %1159 = vmatprep.mubr.f32.mxu0 %v630_v35 }
 0x279   : > { %1160 = vmatmul.mubr.f32.vlgmr.msra.gmra.mrb[4].mxu0 %v631_v36 }
 0x34c   : > { %v1161_v45 = vpop.f32.mrb[4].mxu0 }
 0x34d   : > { %v721_v46 = vpop.f32.mrb[5].mxu0  ;;  %v727_v48 = vadd.f32 %v1161_v45, %v1007_v44 }
 0x34e   : > { %v722_v47 = vadd.f32 %v1007_v44, %v721_v46 }
 0x34f   : > { %v731_v50 = vmax.f32 %v727_v48, 0.0 }
 0x350   : > { %v730_v49 = vmax.f32 %v722_v47, 0.0 }
 0x352   : > { %841 = vmatmul.mubr.f32.vlgmr.msra.gmra.mrb[2].mxu1 %v730_v49 }
 0x353   : > { %846 = vmatprep.mubr.f32.mxu1 %v1611_v43 }
 0x356   : > { %847 = vmatmul.mubr.f32.gmra.mrb[4].mxu1 %v731_v50 }
 0x425   : > { %v842_v58 = vpop.f32.mrb[2].mxu1 }
 0x426   : > { %v843_v59 = vadd.f32 %v842_v58, %v769_v56  ;;  %v844_v60 = vpop.f32.mrb[3].mxu1 }
 0x427   : > { %v845_v61 = vadd.f32 %v844_v60, %v773_v57 }
 0x428   : > { %v853_v62 = vadd.f32 %v843_v59, %v1915_v0 }
 0x429   : > { %v854_v63 = vadd.f32 %v845_v61, %v1911_v25  ;;  %v848_v3 = vpop.f32.mrb[4].mxu1 }
 0x42a   : > { %857 = vst [vmem:[%s409_s18] sm:$0xff] %v853_v62  ;;  %v849_v4 = vadd.f32 %v848_v3, %v769_v56  ;;  %v850_v5 = vpop.f32.mrb[5].mxu1 }
 0x42b   : > { %858 = vst [vmem:[%s409_s18 + $0x8] sm:$0xff] %v854_v63  ;;  %v851_v6 = vadd.f32 %v850_v5, %v773_v57 }
 0x42c   : > { %v855_v0 = vadd.f32 %v849_v4, %v1923_v2 }
 0x42d   : > { %v856_v25 = vadd.f32 %v851_v6, %v1918_v1 }
 0x42e   : > { %859 = vst [vmem:[%s409_s18 + $0x10] sm:$0xff] %v855_v0 }
 0x42f   : > { %860 = vst [vmem:[%s409_s18 + $0x18] sm:$0xff] %v856_v25 }
 0x430   : > { %1539 = shalt.err (!%p1536_p12)
}
 0x431   : > { %s1540_s26 = scalar_lea.hbm %s1949_s15, 512  ;;  %s1544_s18 = scalar_lea.hbm %s2026_s22, 2048 }
 0x432   : > { %p1541_p9 = scmp.ne.s32.totalorder %s1949_s15, %s1540_s26  ;;  %p1545_p4 = scmp.lt.u32.totalorder %s1949_s15, %s2026_s22 }
 0x433   : > { %p1546_p8 = scmp.lt.u32.totalorder %s1544_s18, %s1540_s26  ;;  %p1548_p0 = scmp.lt.u32.totalorder %s1540_s26, %s1949_s15 }
 0x434   : > { %p1542_p13 = pnand %p1541_p9, %p1838_p3 }
 0x435   : > { %p1547_p6 = por %p1546_p8, %p1545_p4 }
 0x436   : > { %p1543_p10 = pneg %p1542_p13 }
 0x437   : > { %p1549_p5 = por %p1548_p0, %p1547_p6 }
 0x439   : > { %p1550_p7 = pnand %p1549_p5, %p1543_p10 }
 0x43b   : > { %1553 = shalt.err (!%p1550_p7)
}
 0x43c   : > { %s1613_s24 = smov 256   ;;  %s1614_s17 = smov 16  }
 0x43d   : > { %1308 = dma.vmem_to_hbm [thread:$0]  (%p1838_p3), %s1943_s16, 512, %s1949_s15, %s862_s13, %s1613_s24, %s1613_s24, %s1614_s17  }
 0x43e PF: > { %s2027_s25 = sld [smem:[#allocation16_spill]]  ;;  %s2028_s14 = sld [smem:[#allocation17_spill]] }
 0x43f   : > { %p1340_p11 = scmp.ge.s32.totalorder %s1600_s12, 2 }
 0x444   : > { %s891_s19 = sand.u32 1, %s2027_s25   ;;  %p2029_p1 = scmp.ne.s32.totalorder %s2028_s14, 0 }
 0x445   : > { %s892_s26 = scalar_lea.sflag [#allocation4], %s891_s19 }
 0x446   : > { %p1328_p2 = pnand %p1340_p11, %p2029_p1 }
 0x448   : > { %1583 = dma.done.wait (!%p1328_p2), %s892_s26, 512  }
 0x449   : > { %1585 = vsyncadd (!%p1328_p2), %s892_s26, 4294966784  ;;  %p24_p12 = scmp.ge.s32.totalorder %s1825_s9, 6   ;;  %s2030_s30 = smov %s1592_s10 }
 0x44a   : > { %s2031_s10 = smov %s1596_s11  ;;  %s2032_s11 = smov %s1834_s28 }
 0x44b   : > { %s2033_s12 = smov %s1825_s9  ;;  %26 = sbr.rel (!%p24_p12) target bundleno = 9 (0x9), region = 117 }
 0x452   :  { %897 = vsyncpa [#allocation3], 1 }
 0x453   :  { %899 = vsyncpa [#allocation3 + $0x1], 1 }
 0x454   :  { %900 = vsyncpa [#allocation6], 1 }
 0x455   :  { %901 = vsyncpa [#allocation9], 1 }
 0x456   :  { %902 = vsyncpa [#allocation4], 1 }
 0x457   :  { %904 = vsyncpa [#allocation4 + $0x1], 1 }

</bundles_post_ra>
